<compile_context>
chip_gen: v7x
topology: tpu7x:2x2x1
jax: 0.10.0
libtpu: 0.0.40
codegen_flags: <defaults>
</compile_context>

<pallas_src>
import functools

import jax
import jax.numpy as jnp
from jax.experimental import pallas as pl
from jax.experimental.pallas import tpu as pltpu


def conv2d_size_out(size, kernel_size=5, stride=2):
    return (size - (kernel_size - 1) - 1) // stride + 1


def _round_up(v, m):
    return ((v + m - 1) // m) * m


# ------------------------------------------------------------------------------------------------
# Geometry (static Python ints only, computed once)
# ------------------------------------------------------------------------------------------------
def make_geometry(w=40, h=30, c=3, out=3):
    KH1, KW1, S1 = 8, 8, 4
    KH2, KW2, S2 = 4, 4, 2
    C1, C2, FC = 32, 64, 128
    OH1, OW1 = conv2d_size_out(h, KH1, S1), conv2d_size_out(w, KW1, S1)
    OH2, OW2 = conv2d_size_out(OH1, KH2, S2), conv2d_size_out(OW1, KW2, S2)
    M1, M2 = OH1 * OW1, OH2 * OW2
    K1 = c * KH1 * KW1
    C1P = _round_up(C1, 128)
    assert KW2 * C1 == C1P, "conv2 lane-packing assumes KW2 * C1 == 128"
    assert out <= 128

    # conv1 output rows are grouped by (row % S2, col % S2) residue class so every conv2 tap
    # reads a contiguous run of OW2 rows (per output row) -- no strided gathers in the kernel.
    nH = {pi: len(range(pi, OH1, S2)) for pi in range(S2)}
    nW = {pj: len(range(pj, OW1, S2)) for pj in range(S2)}
    cls_start, off = {}, 0
    for pi in range(S2):
        for pj in range(S2):
            cls_start[(pi, pj)] = off
            off += nH[pi] * nW[pj]
    assert off == M1

    # Static proof that conv2 never reads outside the real conv1 rows (no pad rows exist).
    for i in range(KH2):
        for j in range(KW2):
            pi, pj, di, dj = i % S2, j % S2, i // S2, j // S2
            for oh2 in range(OH2):
                r0 = cls_start[(pi, pj)] + (oh2 + di) * nW[pj] + dj
                assert 0 <= r0 and r0 + OW2 <= cls_start[(pi, pj)] + nH[pi] * nW[pj] <= M1

    return dict(
        C=c, OUT=out, KH1=KH1, KW1=KW1, S1=S1, KH2=KH2, KW2=KW2, S2=S2,
        C1=C1, C2=C2, FC=FC, OH1=OH1, OW1=OW1, OH2=OH2, OW2=OW2,
        M1=M1, M2=M2, K1=K1, K1p=_round_up(K1, 128),
        C1P=C1P, C2P=_round_up(C2, 128),
        NPAD=_round_up(max(out, 1), 128), NPAD2=_round_up(FC + out, 128),
        nH=nH, nW=nW, cls_start=cls_start,
    )


# ------------------------------------------------------------------------------------------------
# Parameter init (torch layout) and one-time packing into kernel layout
# ------------------------------------------------------------------------------------------------
def init_params(key, w=40, h=30, c=3, out=3, dueling=False):
    convw = conv2d_size_out(conv2d_size_out(w, 8, 4), 4, 2)
    convh = conv2d_size_out(conv2d_size_out(h, 8, 4), 4, 2)
    lin_in = convw * convh * 64
    ks = jax.random.split(key, 6)

    def lin(kk, fan_in, fan_out):
        bound = 1.0 / (fan_in ** 0.5)
        kw_, kb_ = jax.random.split(kk)
        W = jax.random.uniform(kw_, (fan_out, fan_in), jnp.float32, -bound, bound)
        B = jax.random.uniform(kb_, (fan_out,), jnp.float32, -bound, bound)
        return W, B

    def conv(kk, cin, cout, k):
        bound = 1.0 / ((cin * k * k) ** 0.5)
        kw_, kb_ = jax.random.split(kk)
        W = jax.random.uniform(kw_, (cout, cin, k, k), jnp.float32, -bound, bound)
        B = jax.random.uniform(kb_, (cout,), jnp.float32, -bound, bound)
        return W, B

    params = {"conv_1": conv(ks[0], c, 32, 8), "conv_2": conv(ks[1], 32, 64, 4)}
    if not dueling:
        params["fc"] = lin(ks[2], lin_in, 128)
        params["output"] = lin(ks[3], 128, out)
    else:
        params["fc_value_1"] = lin(ks[2], lin_in, 128)
        params["fc_value_2"] = lin(ks[3], 128, 1)
        params["fc_advantage_1"] = lin(ks[4], lin_in, 128)
        params["fc_advantage_2"] = lin(ks[5], 128, out)
    return params


def pack_params(params, geom, dueling=False):
    """One-time conversion to kernel layout: transposed, lane-padded, bf16 weights / f32 biases."""
    f32, bf16 = jnp.float32, jnp.bfloat16
    C1, C2, M2, FC = geom["C1"], geom["C2"], geom["M2"], geom["FC"]
    KH2, KW2 = geom["KH2"], geom["KW2"]
    K1, K1p, C1P, C2P = geom["K1"], geom["K1p"], geom["C1P"], geom["C2P"]
    OUT, NPAD, NPAD2 = geom["OUT"], geom["NPAD"], geom["NPAD2"]
    rep = C1P // C1                                                # 4x lane replication of conv1

    w1, b1 = params["conv_1"]                                      # (C1, c, 8, 8), (C1,)
    w1f = w1.reshape(C1, K1).T                                     # (K1, C1)
    w1p = jnp.zeros((K1p, C1P), f32).at[:K1, :].set(jnp.tile(w1f, (1, rep)))
    b1p = jnp.tile(b1, rep).reshape(1, C1P).astype(f32)

    w2, b2 = params["conv_2"]                                      # (C2, C1, 4, 4), (C2,)
    # group by kernel row i; lanes of group i are (tap column j)*C1 + cin -> no K zero-padding.
    w2t = jnp.transpose(w2, (2, 3, 1, 0)).reshape(KH2, KW2 * C1, C2)
    w2p = jnp.zeros((KH2, C1P, C2P), f32).at[:, :, :C2].set(w2t)
    b2p = jnp.zeros((1, C2P), f32).at[0, :C2].set(b2)

    def pack_fc1(W):                                               # torch (N, C2*M2)
        N = W.shape[0]
        Wr = jnp.transpose(W.reshape(N, C2, M2), (2, 1, 0))        # (M2, C2, N): torch flatten
        return jnp.zeros((M2, C2P, N), f32).at[:, :C2, :].set(Wr)  # order folded into weights

    packed = {"w1": w1p.astype(bf16), "b1": b1p, "w2": w2p.astype(bf16), "b2": b2p}
    if not dueling:
        wfc, bfc = params["fc"]
        wo, bo = params["output"]
        packed["wfc"] = pack_fc1(wfc).astype(bf16)                 # (M2, C2P, FC)
        packed["bfc"] = bfc.reshape(1, FC).astype(f32)
        packed["wo"] = jnp.zeros((FC, NPAD), f32).at[:, :OUT].set(wo.T).astype(bf16)
        packed["bo"] = jnp.zeros((1, NPAD), f32).at[0, :OUT].set(bo)
    else:
        wv1, bv1 = params["fc_value_1"]
        wv2, bv2 = params["fc_value_2"]
        wa1, ba1 = params["fc_advantage_1"]
        wa2, ba2 = params["fc_advantage_2"]
        # value branch in lanes [0, FC), advantage in [FC, 2*FC): one fused fc1 matmul and one
        # block-diagonal head matmul (fills the 256-wide MXU on v6e/v7x; harmless on v5e).
        packed["wfc"] = jnp.concatenate([pack_fc1(wv1), pack_fc1(wa1)], axis=-1).astype(bf16)
        packed["bfc"] = jnp.concatenate([bv1, ba1]).reshape(1, 2 * FC).astype(f32)
        wo = jnp.zeros((2 * FC, NPAD2), f32)
        wo = wo.at[:FC, 0:1].set(wv2.T).at[FC:, FC:FC + OUT].set(wa2.T)
        packed["wo"] = wo.astype(bf16)
        packed["bo"] = (jnp.zeros((1, NPAD2), f32)
                        .at[0, 0].set(bv2[0]).at[0, FC:FC + OUT].set(ba2))
    return packed


# ------------------------------------------------------------------------------------------------
# Fused kernel: one batch tile (BT samples) per grid step; everything stays in VMEM / vregs.
# ------------------------------------------------------------------------------------------------
def _dqn_kernel(p_ref, w1_ref, b1_ref, w2_ref, b2_ref,
                wfc_ref, bfc_ref, wo_ref, bo_ref, o_ref, *, geom, bt):
    M2, OH2, OW2 = geom["M2"], geom["OH2"], geom["OW2"]
    KH2, KW2, S2 = geom["KH2"], geom["KW2"], geom["S2"]
    C1, C1P, C2P = geom["C1"], geom["C1P"], geom["C2P"]
    cls_start, nW = geom["cls_start"], geom["nW"]
    f32, bf16 = jnp.float32, jnp.bfloat16

    # conv1: one matmul, batch folded into the M rows.  h1 row = conv1_position * BT + sample,
    # with the 32 output channels replicated in all 4 lane groups (enables conv2 K-packing).
    h1 = jnp.dot(p_ref[...], w1_ref[...], preferred_element_type=f32)
    h1 = jnp.maximum(h1 + b1_ref[...], 0.0).astype(bf16)          # single bf16 cast

    # conv2: 4 lane-packed tap groups (one per kernel row i); each group is ONE matmul of
    # (M2*BT, 128) x (128, C2P).  Lane group j of the packed slab is taken from tap column j's
    # contiguous row slice with a VPU select (hoisted masks; no rolls / lane shuffles).
    lane = jax.lax.broadcasted_iota(jnp.int32, (M2 * bt, C1P), 1)
    masks = [lane < (j + 1) * C1 for j in range(KW2 - 1)]
    acc = jnp.zeros((M2 * bt, C2P), f32)
    for i in range(KH2):
        pi, di = i % S2, i // S2
        packed = None
        for j in range(KW2 - 1, -1, -1):
            pj, dj = j % S2, j // S2
            parts = []
            for oh2 in range(OH2):
                r0 = cls_start[(pi, pj)] + (oh2 + di) * nW[pj] + dj
                parts.append(h1[r0 * bt:(r0 + OW2) * bt])          # contiguous sublane slice
            slab = parts[0] if OH2 == 1 else jnp.concatenate(parts, axis=0)   # (M2*BT, C1P)
            packed = slab if packed is None else jnp.where(masks[j], slab, packed)
        acc = acc + jnp.dot(packed, w2_ref[i], preferred_element_type=f32)
    h2 = jnp.maximum(acc + b2_ref[...], 0.0).astype(bf16)          # (M2*BT, C2P), single cast

    # fc (+ linear head): the torch flatten order is folded into the packed fc weights; each of
    # the M2 spatial positions is a (BT, C2P)x(C2P, FCN) matmul accumulated in f32 (same weight
    # push count as a single K=M2*C2P matmul, but needs no sublane->lane relayout of h2).
    fc = jnp.zeros((bt, wfc_ref.shape[2]), f32)
    for m in range(M2):
        fc = fc + jnp.dot(h2[m * bt:(m + 1) * bt], wfc_ref[m], preferred_element_type=f32)
    fc = jnp.maximum(fc + bfc_ref[...], 0.0).astype(bf16)
    o_ref[...] = jnp.dot(fc, wo_ref[...], preferred_element_type=f32) + bo_ref[...]


# ------------------------------------------------------------------------------------------------
# Host-side patch extraction + wrapper
# ------------------------------------------------------------------------------------------------
def _conv1_patches(x, geom, Bp, BT):
    """conv1 im2col with rows ordered (batch-tile, residue-class conv1 position, sample); built
    from static strided slices only (no runtime gather)."""
    # TODO(synk): conv1 patch extraction is still XLA glue feeding the kernel; folding the 8x8
    # tap gather in-kernel would require strided in-kernel HBM loads.
    B, C, H, W = x.shape
    KH1, KW1, S1, S2 = geom["KH1"], geom["KW1"], geom["S1"], geom["S2"]
    K1, K1p, M1 = geom["K1"], geom["K1p"], geom["M1"]
    stride = S1 * S2
    classes = []
    for pi in range(S2):
        for pj in range(S2):
            nH, nW = geom["nH"][pi], geom["nW"][pj]
            taps = []
            for i in range(KH1):
                for j in range(KW1):
                    r0, c0 = pi * S1 + i, pj * S1 + j
                    taps.append(x[:, :, r0:r0 + stride * (nH - 1) + 1:stride,
                                        c0:c0 + stride * (nW - 1) + 1:stride])   # (B, C, nH, nW)
            t = jnp.stack(taps, axis=2)                      # (B, C, KH1*KW1, nH, nW)
            t = jnp.transpose(t, (3, 4, 0, 1, 2))            # (nH, nW, B, C, taps)
            classes.append(t.reshape(nH * nW, B, C * KH1 * KW1))
    p = jnp.concatenate(classes, axis=0)                     # (M1, B, K1)
    p = jnp.pad(p, ((0, 0), (0, Bp - B), (0, K1p - K1)))
    T = Bp // BT
    p = p.reshape(M1, T, BT, K1p).transpose(1, 0, 2, 3).reshape(T * M1 * BT, K1p)
    return p.astype(jnp.bfloat16)


def dqnetwork_forward(packed, x, geom, dueling=False, bt=16):
    """x: (B, C, H, W) float32 NCHW -> (B, out) float32."""
    B = x.shape[0]
    if B <= bt:
        BT = B                            # one tile holds the whole batch
    else:
        BT = max(8, (bt // 8) * 8)        # sublane-aligned tile; >=2 tiles lets v7x's 2 TCs split
    T = pl.cdiv(B, BT)
    Bp = T * BT

    patches = _conv1_patches(x, geom, Bp, BT)

    M1, M2, K1p = geom["M1"], geom["M2"], geom["K1p"]
    C1P, C2P, FC, KH2 = geom["C1P"], geom["C2P"], geom["FC"], geom["KH2"]
    FCN = FC if not dueling else 2 * FC
    NOUT = geom["NPAD"] if not dueling else geom["NPAD2"]

    def const(*shape):
        return pl.BlockSpec(shape, lambda t: (0,) * len(shape))   # weights stay VMEM-resident

    out = pl.pallas_call(
        functools.partial(_dqn_kernel, geom=geom, bt=BT),
        out_shape=jax.ShapeDtypeStruct((Bp, NOUT), jnp.float32),
        grid=(T,),
        in_specs=[
            pl.BlockSpec((M1 * BT, K1p), lambda t: (t, 0)),        # patches: batch-tiled
            const(K1p, C1P), const(1, C1P),                        # conv1
            const(KH2, C1P, C2P), const(1, C2P),                   # conv2 (lane-packed groups)
            const(M2, C2P, FCN), const(1, FCN),                    # fc1 (value||advantage fused)
            const(FCN, NOUT), const(1, NOUT),                      # head(s)
        ],
        out_specs=pl.BlockSpec((BT, NOUT), lambda t: (t, 0)),      # lane-dense 128/256-wide store
        compiler_params=pltpu.CompilerParams(dimension_semantics=("parallel",)),
    )(patches, packed["w1"], packed["b1"], packed["w2"], packed["b2"],
      packed["wfc"], packed["bfc"], packed["wo"], packed["bo"])

    if not dueling:
        return out[:B, :geom["OUT"]]
    v = out[:B, 0:1]
    a = out[:B, FC:FC + geom["OUT"]]
    # torch: x1 + x2 - torch.mean(x2)   (scalar mean over ALL advantage elements, incl. batch)
    return v + a - jnp.mean(a)


if __name__ == "__main__":
    key = jax.random.PRNGKey(0)
    pkey, xkey = jax.random.split(key)

    # Module defaults: w=40, h=30, c=3, out=3; small batch of 2.
    W, H, C, OUT, BATCH = 40, 30, 3, 3, 2
    geom = make_geometry(w=W, h=H, c=C, out=OUT)
    params = init_params(pkey, w=W, h=H, c=C, out=OUT, dueling=False)
    packed = pack_params(params, geom, dueling=False)

    x = jax.random.normal(xkey, (BATCH, C, H, W), dtype=jnp.float32)
    fwd = jax.jit(functools.partial(dqnetwork_forward, geom=geom, dueling=False))
    q = jax.block_until_ready(fwd(packed, x))
    assert q.shape == (BATCH, OUT), q.shape
    assert q.dtype == jnp.float32
    print("KERNEL_OK")
</pallas_src>

<mosaic_0001>
module attributes {stable_mosaic.version = 11 : i64} {
  func.func @_dqn_kernel(%arg0: i32, %arg1: memref<108x256xbf16, #tpu.memory_space<vmem>>, %arg2: memref<256x128xbf16, #tpu.memory_space<vmem>>, %arg3: memref<1x128xf32, #tpu.memory_space<vmem>>, %arg4: memref<4x128x128xbf16, #tpu.memory_space<vmem>>, %arg5: memref<1x128xf32, #tpu.memory_space<vmem>>, %arg6: memref<6x128x128xbf16, #tpu.memory_space<vmem>>, %arg7: memref<1x128xf32, #tpu.memory_space<vmem>>, %arg8: memref<128x128xbf16, #tpu.memory_space<vmem>>, %arg9: memref<1x128xf32, #tpu.memory_space<vmem>>, %arg10: memref<2x128xf32, #tpu.memory_space<vmem>>) attributes {dimension_semantics = [#tpu.dimension_semantics<parallel>], iteration_bounds = array<i64: 1>, scalar_prefetch = 0 : i64, scratch_operands = 0 : i64, tpu.core_type = #tpu.core_type<tc>, window_params = [{transform_indices = @transform_0, window_bounds = array<i64: 108, 256>}, {pipeline_mode = #tpu.pipeline_mode<synchronous>, transform_indices = @transform_1, window_bounds = array<i64: 256, 128>}, {pipeline_mode = #tpu.pipeline_mode<synchronous>, transform_indices = @transform_2, window_bounds = array<i64: 1, 128>}, {pipeline_mode = #tpu.pipeline_mode<synchronous>, transform_indices = @transform_3, window_bounds = array<i64: 4, 128, 128>}, {pipeline_mode = #tpu.pipeline_mode<synchronous>, transform_indices = @transform_4, window_bounds = array<i64: 1, 128>}, {pipeline_mode = #tpu.pipeline_mode<synchronous>, transform_indices = @transform_5, window_bounds = array<i64: 6, 128, 128>}, {pipeline_mode = #tpu.pipeline_mode<synchronous>, transform_indices = @transform_6, window_bounds = array<i64: 1, 128>}, {pipeline_mode = #tpu.pipeline_mode<synchronous>, transform_indices = @transform_7, window_bounds = array<i64: 128, 128>}, {pipeline_mode = #tpu.pipeline_mode<synchronous>, transform_indices = @transform_8, window_bounds = array<i64: 1, 128>}, {transform_indices = @transform_9, window_bounds = array<i64: 2, 128>}]} {
    %c0 = arith.constant 0 : index
    %c0_0 = arith.constant 0 : index
    %0 = vector.load %arg1[%c0, %c0_0] : memref<108x256xbf16, #tpu.memory_space<vmem>>, vector<108x256xbf16>
    %c0_1 = arith.constant 0 : index
    %c0_2 = arith.constant 0 : index
    %1 = vector.load %arg2[%c0_1, %c0_2] : memref<256x128xbf16, #tpu.memory_space<vmem>>, vector<256x128xbf16>
    %cst = arith.constant dense<0.000000e+00> : vector<108x128xf32>
    %2 = tpu.matmul %0, %1, %cst {dimension_numbers = #tpu.dot_dimension_numbers<[1], [0], [0], [1], [0, 0, 1, 1], [], []>} : vector<108x256xbf16>, vector<256x128xbf16>, vector<108x128xf32> -> vector<108x128xf32>
    %c0_3 = arith.constant 0 : index
    %c0_4 = arith.constant 0 : index
    %3 = vector.load %arg3[%c0_3, %c0_4] : memref<1x128xf32, #tpu.memory_space<vmem>>, vector<1x128xf32>
    %4 = vector.broadcast %3 : vector<1x128xf32> to vector<108x128xf32>
    %5 = arith.addf %2, %4 : vector<108x128xf32>
    %cst_5 = arith.constant 0.000000e+00 : f32
    %6 = vector.broadcast %cst_5 : f32 to vector<108x128xf32>
    %7 = arith.maximumf %5, %6 : vector<108x128xf32>
    %8 = arith.truncf %7 : vector<108x128xf32> to vector<108x128xbf16>
    %9 = tpu.iota {dimensions = array<i32: 1>} : vector<12x128xi32>
    %c32_i32 = arith.constant 32 : i32
    %10 = vector.broadcast %c32_i32 : i32 to vector<12x128xi32>
    %11 = arith.cmpi slt, %9, %10 : vector<12x128xi32>
    %c64_i32 = arith.constant 64 : i32
    %12 = vector.broadcast %c64_i32 : i32 to vector<12x128xi32>
    %13 = arith.cmpi slt, %9, %12 : vector<12x128xi32>
    %c96_i32 = arith.constant 96 : i32
    %14 = vector.broadcast %c96_i32 : i32 to vector<12x128xi32>
    %15 = arith.cmpi slt, %9, %14 : vector<12x128xi32>
    %cst_6 = arith.constant 0.000000e+00 : f32
    %16 = vector.broadcast %cst_6 : f32 to vector<12x128xf32>
    %17 = vector.extract_strided_slice %8 {offsets = [32, 0], sizes = [6, 128], strides = [1, 1]} : vector<108x128xbf16> to vector<6x128xbf16>
    %18 = vector.extract_strided_slice %8 {offsets = [40, 0], sizes = [6, 128], strides = [1, 1]} : vector<108x128xbf16> to vector<6x128xbf16>
    %19 = tpu.concatenate %17, %18 in 0 : vector<6x128xbf16>, vector<6x128xbf16> -> vector<12x128xbf16>
    %20 = vector.extract_strided_slice %8 {offsets = [2, 0], sizes = [6, 128], strides = [1, 1]} : vector<108x128xbf16> to vector<6x128xbf16>
    %21 = vector.extract_strided_slice %8 {offsets = [12, 0], sizes = [6, 128], strides = [1, 1]} : vector<108x128xbf16> to vector<6x128xbf16>
    %22 = tpu.concatenate %20, %21 in 0 : vector<6x128xbf16>, vector<6x128xbf16> -> vector<12x128xbf16>
    %23 = arith.select %15, %22, %19 : vector<12x128xi1>, vector<12x128xbf16>
    %24 = vector.extract_strided_slice %8 {offsets = [30, 0], sizes = [6, 128], strides = [1, 1]} : vector<108x128xbf16> to vector<6x128xbf16>
    %25 = vector.extract_strided_slice %8 {offsets = [38, 0], sizes = [6, 128], strides = [1, 1]} : vector<108x128xbf16> to vector<6x128xbf16>
    %26 = tpu.concatenate %24, %25 in 0 : vector<6x128xbf16>, vector<6x128xbf16> -> vector<12x128xbf16>
    %27 = arith.select %13, %26, %23 : vector<12x128xi1>, vector<12x128xbf16>
    %28 = vector.extract_strided_slice %8 {offsets = [0, 0], sizes = [6, 128], strides = [1, 1]} : vector<108x128xbf16> to vector<6x128xbf16>
    %29 = vector.extract_strided_slice %8 {offsets = [10, 0], sizes = [6, 128], strides = [1, 1]} : vector<108x128xbf16> to vector<6x128xbf16>
    %30 = tpu.concatenate %28, %29 in 0 : vector<6x128xbf16>, vector<6x128xbf16> -> vector<12x128xbf16>
    %31 = arith.select %11, %30, %27 : vector<12x128xi1>, vector<12x128xbf16>
    %c0_7 = arith.constant 0 : index
    %c0_8 = arith.constant 0 : index
    %c0_9 = arith.constant 0 : index
    %32 = vector.load %arg4[%c0_7, %c0_8, %c0_9] : memref<4x128x128xbf16, #tpu.memory_space<vmem>>, vector<1x128x128xbf16>
    %33 = vector.shape_cast %32 : vector<1x128x128xbf16> to vector<128x128xbf16>
    %cst_10 = arith.constant dense<0.000000e+00> : vector<12x128xf32>
    %34 = tpu.matmul %31, %33, %cst_10 {dimension_numbers = #tpu.dot_dimension_numbers<[1], [0], [0], [1], [0, 0, 1, 1], [], []>} : vector<12x128xbf16>, vector<128x128xbf16>, vector<12x128xf32> -> vector<12x128xf32>
    %35 = arith.addf %16, %34 : vector<12x128xf32>
    %36 = vector.extract_strided_slice %8 {offsets = [86, 0], sizes = [6, 128], strides = [1, 1]} : vector<108x128xbf16> to vector<6x128xbf16>
    %37 = vector.extract_strided_slice %8 {offsets = [94, 0], sizes = [6, 128], strides = [1, 1]} : vector<108x128xbf16> to vector<6x128xbf16>
    %38 = tpu.concatenate %36, %37 in 0 : vector<6x128xbf16>, vector<6x128xbf16> -> vector<12x128xbf16>
    %39 = vector.extract_strided_slice %8 {offsets = [56, 0], sizes = [6, 128], strides = [1, 1]} : vector<108x128xbf16> to vector<6x128xbf16>
    %40 = vector.extract_strided_slice %8 {offsets = [66, 0], sizes = [6, 128], strides = [1, 1]} : vector<108x128xbf16> to vector<6x128xbf16>
    %41 = tpu.concatenate %39, %40 in 0 : vector<6x128xbf16>, vector<6x128xbf16> -> vector<12x128xbf16>
    %42 = arith.select %15, %41, %38 : vector<12x128xi1>, vector<12x128xbf16>
    %43 = vector.extract_strided_slice %8 {offsets = [84, 0], sizes = [6, 128], strides = [1, 1]} : vector<108x128xbf16> to vector<6x128xbf16>
    %44 = vector.extract_strided_slice %8 {offsets = [92, 0], sizes = [6, 128], strides = [1, 1]} : vector<108x128xbf16> to vector<6x128xbf16>
    %45 = tpu.concatenate %43, %44 in 0 : vector<6x128xbf16>, vector<6x128xbf16> -> vector<12x128xbf16>
    %46 = arith.select %13, %45, %42 : vector<12x128xi1>, vector<12x128xbf16>
    %47 = vector.extract_strided_slice %8 {offsets = [54, 0], sizes = [6, 128], strides = [1, 1]} : vector<108x128xbf16> to vector<6x128xbf16>
    %48 = vector.extract_strided_slice %8 {offsets = [64, 0], sizes = [6, 128], strides = [1, 1]} : vector<108x128xbf16> to vector<6x128xbf16>
    %49 = tpu.concatenate %47, %48 in 0 : vector<6x128xbf16>, vector<6x128xbf16> -> vector<12x128xbf16>
    %50 = arith.select %11, %49, %46 : vector<12x128xi1>, vector<12x128xbf16>
    %c1 = arith.constant 1 : index
    %c0_11 = arith.constant 0 : index
    %c0_12 = arith.constant 0 : index
    %51 = vector.load %arg4[%c1, %c0_11, %c0_12] : memref<4x128x128xbf16, #tpu.memory_space<vmem>>, vector<1x128x128xbf16>
    %52 = vector.shape_cast %51 : vector<1x128x128xbf16> to vector<128x128xbf16>
    %cst_13 = arith.constant dense<0.000000e+00> : vector<12x128xf32>
    %53 = tpu.matmul %50, %52, %cst_13 {dimension_numbers = #tpu.dot_dimension_numbers<[1], [0], [0], [1], [0, 0, 1, 1], [], []>} : vector<12x128xbf16>, vector<128x128xbf16>, vector<12x128xf32> -> vector<12x128xf32>
    %54 = arith.addf %35, %53 : vector<12x128xf32>
    %55 = vector.extract_strided_slice %8 {offsets = [40, 0], sizes = [6, 128], strides = [1, 1]} : vector<108x128xbf16> to vector<6x128xbf16>
    %56 = vector.extract_strided_slice %8 {offsets = [48, 0], sizes = [6, 128], strides = [1, 1]} : vector<108x128xbf16> to vector<6x128xbf16>
    %57 = tpu.concatenate %55, %56 in 0 : vector<6x128xbf16>, vector<6x128xbf16> -> vector<12x128xbf16>
    %58 = vector.extract_strided_slice %8 {offsets = [12, 0], sizes = [6, 128], strides = [1, 1]} : vector<108x128xbf16> to vector<6x128xbf16>
    %59 = vector.extract_strided_slice %8 {offsets = [22, 0], sizes = [6, 128], strides = [1, 1]} : vector<108x128xbf16> to vector<6x128xbf16>
    %60 = tpu.concatenate %58, %59 in 0 : vector<6x128xbf16>, vector<6x128xbf16> -> vector<12x128xbf16>
    %61 = arith.select %15, %60, %57 : vector<12x128xi1>, vector<12x128xbf16>
    %62 = vector.extract_strided_slice %8 {offsets = [38, 0], sizes = [6, 128], strides = [1, 1]} : vector<108x128xbf16> to vector<6x128xbf16>
    %63 = vector.extract_strided_slice %8 {offsets = [46, 0], sizes = [6, 128], strides = [1, 1]} : vector<108x128xbf16> to vector<6x128xbf16>
    %64 = tpu.concatenate %62, %63 in 0 : vector<6x128xbf16>, vector<6x128xbf16> -> vector<12x128xbf16>
    %65 = arith.select %13, %64, %61 : vector<12x128xi1>, vector<12x128xbf16>
    %66 = vector.extract_strided_slice %8 {offsets = [10, 0], sizes = [6, 128], strides = [1, 1]} : vector<108x128xbf16> to vector<6x128xbf16>
    %67 = vector.extract_strided_slice %8 {offsets = [20, 0], sizes = [6, 128], strides = [1, 1]} : vector<108x128xbf16> to vector<6x128xbf16>
    %68 = tpu.concatenate %66, %67 in 0 : vector<6x128xbf16>, vector<6x128xbf16> -> vector<12x128xbf16>
    %69 = arith.select %11, %68, %65 : vector<12x128xi1>, vector<12x128xbf16>
    %c2 = arith.constant 2 : index
    %c0_14 = arith.constant 0 : index
    %c0_15 = arith.constant 0 : index
    %70 = vector.load %arg4[%c2, %c0_14, %c0_15] : memref<4x128x128xbf16, #tpu.memory_space<vmem>>, vector<1x128x128xbf16>
    %71 = vector.shape_cast %70 : vector<1x128x128xbf16> to vector<128x128xbf16>
    %cst_16 = arith.constant dense<0.000000e+00> : vector<12x128xf32>
    %72 = tpu.matmul %69, %71, %cst_16 {dimension_numbers = #tpu.dot_dimension_numbers<[1], [0], [0], [1], [0, 0, 1, 1], [], []>} : vector<12x128xbf16>, vector<128x128xbf16>, vector<12x128xf32> -> vector<12x128xf32>
    %73 = arith.addf %54, %72 : vector<12x128xf32>
    %74 = vector.extract_strided_slice %8 {offsets = [94, 0], sizes = [6, 128], strides = [1, 1]} : vector<108x128xbf16> to vector<6x128xbf16>
    %75 = vector.extract_strided_slice %8 {offsets = [102, 0], sizes = [6, 128], strides = [1, 1]} : vector<108x128xbf16> to vector<6x128xbf16>
    %76 = tpu.concatenate %74, %75 in 0 : vector<6x128xbf16>, vector<6x128xbf16> -> vector<12x128xbf16>
    %77 = vector.extract_strided_slice %8 {offsets = [66, 0], sizes = [6, 128], strides = [1, 1]} : vector<108x128xbf16> to vector<6x128xbf16>
    %78 = vector.extract_strided_slice %8 {offsets = [76, 0], sizes = [6, 128], strides = [1, 1]} : vector<108x128xbf16> to vector<6x128xbf16>
    %79 = tpu.concatenate %77, %78 in 0 : vector<6x128xbf16>, vector<6x128xbf16> -> vector<12x128xbf16>
    %80 = arith.select %15, %79, %76 : vector<12x128xi1>, vector<12x128xbf16>
    %81 = vector.extract_strided_slice %8 {offsets = [92, 0], sizes = [6, 128], strides = [1, 1]} : vector<108x128xbf16> to vector<6x128xbf16>
    %82 = vector.extract_strided_slice %8 {offsets = [100, 0], sizes = [6, 128], strides = [1, 1]} : vector<108x128xbf16> to vector<6x128xbf16>
    %83 = tpu.concatenate %81, %82 in 0 : vector<6x128xbf16>, vector<6x128xbf16> -> vector<12x128xbf16>
    %84 = arith.select %13, %83, %80 : vector<12x128xi1>, vector<12x128xbf16>
    %85 = vector.extract_strided_slice %8 {offsets = [64, 0], sizes = [6, 128], strides = [1, 1]} : vector<108x128xbf16> to vector<6x128xbf16>
    %86 = vector.extract_strided_slice %8 {offsets = [74, 0], sizes = [6, 128], strides = [1, 1]} : vector<108x128xbf16> to vector<6x128xbf16>
    %87 = tpu.concatenate %85, %86 in 0 : vector<6x128xbf16>, vector<6x128xbf16> -> vector<12x128xbf16>
    %88 = arith.select %11, %87, %84 : vector<12x128xi1>, vector<12x128xbf16>
    %c3 = arith.constant 3 : index
    %c0_17 = arith.constant 0 : index
    %c0_18 = arith.constant 0 : index
    %89 = vector.load %arg4[%c3, %c0_17, %c0_18] : memref<4x128x128xbf16, #tpu.memory_space<vmem>>, vector<1x128x128xbf16>
    %90 = vector.shape_cast %89 : vector<1x128x128xbf16> to vector<128x128xbf16>
    %cst_19 = arith.constant dense<0.000000e+00> : vector<12x128xf32>
    %91 = tpu.matmul %88, %90, %cst_19 {dimension_numbers = #tpu.dot_dimension_numbers<[1], [0], [0], [1], [0, 0, 1, 1], [], []>} : vector<12x128xbf16>, vector<128x128xbf16>, vector<12x128xf32> -> vector<12x128xf32>
    %92 = arith.addf %73, %91 : vector<12x128xf32>
    %c0_20 = arith.constant 0 : index
    %c0_21 = arith.constant 0 : index
    %93 = vector.load %arg5[%c0_20, %c0_21] : memref<1x128xf32, #tpu.memory_space<vmem>>, vector<1x128xf32>
    %94 = vector.broadcast %93 : vector<1x128xf32> to vector<12x128xf32>
    %95 = arith.addf %92, %94 : vector<12x128xf32>
    %cst_22 = arith.constant 0.000000e+00 : f32
    %96 = vector.broadcast %cst_22 : f32 to vector<12x128xf32>
    %97 = arith.maximumf %95, %96 : vector<12x128xf32>
    %98 = arith.truncf %97 : vector<12x128xf32> to vector<12x128xbf16>
    %cst_23 = arith.constant 0.000000e+00 : f32
    %99 = vector.broadcast %cst_23 : f32 to vector<2x128xf32>
    %100 = vector.extract_strided_slice %98 {offsets = [0, 0], sizes = [2, 128], strides = [1, 1]} : vector<12x128xbf16> to vector<2x128xbf16>
    %c0_24 = arith.constant 0 : index
    %c0_25 = arith.constant 0 : index
    %c0_26 = arith.constant 0 : index
    %101 = vector.load %arg6[%c0_24, %c0_25, %c0_26] : memref<6x128x128xbf16, #tpu.memory_space<vmem>>, vector<1x128x128xbf16>
    %102 = vector.shape_cast %101 : vector<1x128x128xbf16> to vector<128x128xbf16>
    %cst_27 = arith.constant dense<0.000000e+00> : vector<2x128xf32>
    %103 = tpu.matmul %100, %102, %cst_27 {dimension_numbers = #tpu.dot_dimension_numbers<[1], [0], [0], [1], [0, 0, 1, 1], [], []>} : vector<2x128xbf16>, vector<128x128xbf16>, vector<2x128xf32> -> vector<2x128xf32>
    %104 = arith.addf %99, %103 : vector<2x128xf32>
    %105 = vector.extract_strided_slice %98 {offsets = [2, 0], sizes = [2, 128], strides = [1, 1]} : vector<12x128xbf16> to vector<2x128xbf16>
    %c1_28 = arith.constant 1 : index
    %c0_29 = arith.constant 0 : index
    %c0_30 = arith.constant 0 : index
    %106 = vector.load %arg6[%c1_28, %c0_29, %c0_30] : memref<6x128x128xbf16, #tpu.memory_space<vmem>>, vector<1x128x128xbf16>
    %107 = vector.shape_cast %106 : vector<1x128x128xbf16> to vector<128x128xbf16>
    %cst_31 = arith.constant dense<0.000000e+00> : vector<2x128xf32>
    %108 = tpu.matmul %105, %107, %cst_31 {dimension_numbers = #tpu.dot_dimension_numbers<[1], [0], [0], [1], [0, 0, 1, 1], [], []>} : vector<2x128xbf16>, vector<128x128xbf16>, vector<2x128xf32> -> vector<2x128xf32>
    %109 = arith.addf %104, %108 : vector<2x128xf32>
    %110 = vector.extract_strided_slice %98 {offsets = [4, 0], sizes = [2, 128], strides = [1, 1]} : vector<12x128xbf16> to vector<2x128xbf16>
    %c2_32 = arith.constant 2 : index
    %c0_33 = arith.constant 0 : index
    %c0_34 = arith.constant 0 : index
    %111 = vector.load %arg6[%c2_32, %c0_33, %c0_34] : memref<6x128x128xbf16, #tpu.memory_space<vmem>>, vector<1x128x128xbf16>
    %112 = vector.shape_cast %111 : vector<1x128x128xbf16> to vector<128x128xbf16>
    %cst_35 = arith.constant dense<0.000000e+00> : vector<2x128xf32>
    %113 = tpu.matmul %110, %112, %cst_35 {dimension_numbers = #tpu.dot_dimension_numbers<[1], [0], [0], [1], [0, 0, 1, 1], [], []>} : vector<2x128xbf16>, vector<128x128xbf16>, vector<2x128xf32> -> vector<2x128xf32>
    %114 = arith.addf %109, %113 : vector<2x128xf32>
    %115 = vector.extract_strided_slice %98 {offsets = [6, 0], sizes = [2, 128], strides = [1, 1]} : vector<12x128xbf16> to vector<2x128xbf16>
    %c3_36 = arith.constant 3 : index
    %c0_37 = arith.constant 0 : index
    %c0_38 = arith.constant 0 : index
    %116 = vector.load %arg6[%c3_36, %c0_37, %c0_38] : memref<6x128x128xbf16, #tpu.memory_space<vmem>>, vector<1x128x128xbf16>
    %117 = vector.shape_cast %116 : vector<1x128x128xbf16> to vector<128x128xbf16>
    %cst_39 = arith.constant dense<0.000000e+00> : vector<2x128xf32>
    %118 = tpu.matmul %115, %117, %cst_39 {dimension_numbers = #tpu.dot_dimension_numbers<[1], [0], [0], [1], [0, 0, 1, 1], [], []>} : vector<2x128xbf16>, vector<128x128xbf16>, vector<2x128xf32> -> vector<2x128xf32>
    %119 = arith.addf %114, %118 : vector<2x128xf32>
    %120 = vector.extract_strided_slice %98 {offsets = [8, 0], sizes = [2, 128], strides = [1, 1]} : vector<12x128xbf16> to vector<2x128xbf16>
    %c4 = arith.constant 4 : index
    %c0_40 = arith.constant 0 : index
    %c0_41 = arith.constant 0 : index
    %121 = vector.load %arg6[%c4, %c0_40, %c0_41] : memref<6x128x128xbf16, #tpu.memory_space<vmem>>, vector<1x128x128xbf16>
    %122 = vector.shape_cast %121 : vector<1x128x128xbf16> to vector<128x128xbf16>
    %cst_42 = arith.constant dense<0.000000e+00> : vector<2x128xf32>
    %123 = tpu.matmul %120, %122, %cst_42 {dimension_numbers = #tpu.dot_dimension_numbers<[1], [0], [0], [1], [0, 0, 1, 1], [], []>} : vector<2x128xbf16>, vector<128x128xbf16>, vector<2x128xf32> -> vector<2x128xf32>
    %124 = arith.addf %119, %123 : vector<2x128xf32>
    %125 = vector.extract_strided_slice %98 {offsets = [10, 0], sizes = [2, 128], strides = [1, 1]} : vector<12x128xbf16> to vector<2x128xbf16>
    %c5 = arith.constant 5 : index
    %c0_43 = arith.constant 0 : index
    %c0_44 = arith.constant 0 : index
    %126 = vector.load %arg6[%c5, %c0_43, %c0_44] : memref<6x128x128xbf16, #tpu.memory_space<vmem>>, vector<1x128x128xbf16>
    %127 = vector.shape_cast %126 : vector<1x128x128xbf16> to vector<128x128xbf16>
    %cst_45 = arith.constant dense<0.000000e+00> : vector<2x128xf32>
    %128 = tpu.matmul %125, %127, %cst_45 {dimension_numbers = #tpu.dot_dimension_numbers<[1], [0], [0], [1], [0, 0, 1, 1], [], []>} : vector<2x128xbf16>, vector<128x128xbf16>, vector<2x128xf32> -> vector<2x128xf32>
    %129 = arith.addf %124, %128 : vector<2x128xf32>
    %c0_46 = arith.constant 0 : index
    %c0_47 = arith.constant 0 : index
    %130 = vector.load %arg7[%c0_46, %c0_47] : memref<1x128xf32, #tpu.memory_space<vmem>>, vector<1x128xf32>
    %131 = vector.broadcast %130 : vector<1x128xf32> to vector<2x128xf32>
    %132 = arith.addf %129, %131 : vector<2x128xf32>
    %cst_48 = arith.constant 0.000000e+00 : f32
    %133 = vector.broadcast %cst_48 : f32 to vector<2x128xf32>
    %134 = arith.maximumf %132, %133 : vector<2x128xf32>
    %135 = arith.truncf %134 : vector<2x128xf32> to vector<2x128xbf16>
    %c0_49 = arith.constant 0 : index
    %c0_50 = arith.constant 0 : index
    %136 = vector.load %arg8[%c0_49, %c0_50] : memref<128x128xbf16, #tpu.memory_space<vmem>>, vector<128x128xbf16>
    %cst_51 = arith.constant dense<0.000000e+00> : vector<2x128xf32>
    %137 = tpu.matmul %135, %136, %cst_51 {dimension_numbers = #tpu.dot_dimension_numbers<[1], [0], [0], [1], [0, 0, 1, 1], [], []>} : vector<2x128xbf16>, vector<128x128xbf16>, vector<2x128xf32> -> vector<2x128xf32>
    %c0_52 = arith.constant 0 : index
    %c0_53 = arith.constant 0 : index
    %138 = vector.load %arg9[%c0_52, %c0_53] : memref<1x128xf32, #tpu.memory_space<vmem>>, vector<1x128xf32>
    %139 = vector.broadcast %138 : vector<1x128xf32> to vector<2x128xf32>
    %140 = arith.addf %137, %139 : vector<2x128xf32>
    %c0_54 = arith.constant 0 : index
    %c0_55 = arith.constant 0 : index
    %141 = vector.load %arg10[%c0_54, %c0_55] : memref<2x128xf32, #tpu.memory_space<vmem>>, vector<2x128xf32>
    tpu.vector_store %arg10[%c0_54, %c0_55], %140 {strides = array<i32>} : memref<2x128xf32, #tpu.memory_space<vmem>>, vector<2x128xf32>,
    return
  }
  func.func @transform_0(%arg0: i32) -> (i32, i32) {
    %c0_i32 = arith.constant 0 : i32
    %c0_i32_0 = arith.constant 0 : i32
    return %arg0, %c0_i32 : i32, i32
  }
  func.func @transform_1(%arg0: i32) -> (i32, i32) {
    %c0_i32 = arith.constant 0 : i32
    %c0_i32_0 = arith.constant 0 : i32
    %c0_i32_1 = arith.constant 0 : i32
    return %c0_i32, %c0_i32_0 : i32, i32
  }
  func.func @transform_2(%arg0: i32) -> (i32, i32) {
    %c0_i32 = arith.constant 0 : i32
    %c0_i32_0 = arith.constant 0 : i32
    %c0_i32_1 = arith.constant 0 : i32
    return %c0_i32, %c0_i32_0 : i32, i32
  }
  func.func @transform_3(%arg0: i32) -> (i32, i32, i32) {
    %c0_i32 = arith.constant 0 : i32
    %c0_i32_0 = arith.constant 0 : i32
    %c0_i32_1 = arith.constant 0 : i32
    %c0_i32_2 = arith.constant 0 : i32
    return %c0_i32, %c0_i32_0, %c0_i32_1 : i32, i32, i32
  }
  func.func @transform_4(%arg0: i32) -> (i32, i32) {
    %c0_i32 = arith.constant 0 : i32
    %c0_i32_0 = arith.constant 0 : i32
    %c0_i32_1 = arith.constant 0 : i32
    return %c0_i32, %c0_i32_0 : i32, i32
  }
  func.func @transform_5(%arg0: i32) -> (i32, i32, i32) {
    %c0_i32 = arith.constant 0 : i32
    %c0_i32_0 = arith.constant 0 : i32
    %c0_i32_1 = arith.constant 0 : i32
    %c0_i32_2 = arith.constant 0 : i32
    return %c0_i32, %c0_i32_0, %c0_i32_1 : i32, i32, i32
  }
  func.func @transform_6(%arg0: i32) -> (i32, i32) {
    %c0_i32 = arith.constant 0 : i32
    %c0_i32_0 = arith.constant 0 : i32
    %c0_i32_1 = arith.constant 0 : i32
    return %c0_i32, %c0_i32_0 : i32, i32
  }
  func.func @transform_7(%arg0: i32) -> (i32, i32) {
    %c0_i32 = arith.constant 0 : i32
    %c0_i32_0 = arith.constant 0 : i32
    %c0_i32_1 = arith.constant 0 : i32
    return %c0_i32, %c0_i32_0 : i32, i32
  }
  func.func @transform_8(%arg0: i32) -> (i32, i32) {
    %c0_i32 = arith.constant 0 : i32
    %c0_i32_0 = arith.constant 0 : i32
    %c0_i32_1 = arith.constant 0 : i32
    return %c0_i32, %c0_i32_0 : i32, i32
  }
  func.func @transform_9(%arg0: i32) -> (i32, i32) {
    %c0_i32 = arith.constant 0 : i32
    %c0_i32_0 = arith.constant 0 : i32
    return %arg0, %c0_i32 : i32, i32
  }
}

</mosaic_0001>

<bundles_post_ra>
// kernel: dqnetwork_forward.1
= control target key start
LH: loop header
LB: loop body
LE: loop exit
PB: predicated region body
PF: predicated region fallthrough
CT: control target
= control target key end

     0   :  { %s3172_s0 = inlined_call_operand.vmem [shape: bf16[108,256], index: 0, kind: input, shape index: {}]   ;;  %s3173_s1 = inlined_call_operand.vmem [shape: bf16[256,128], index: 1, kind: input, shape index: {}]   ;;  %s3174_s2 = inlined_call_operand.vmem [shape: f32[1,128], index: 2, kind: input, shape index: {}]   ;;  %s3175_s3 = inlined_call_operand.vmem [shape: bf16[4,128,128], index: 3, kind: input, shape index: {}]   ;;  %s3176_s4 = inlined_call_operand.vmem [shape: f32[1,128], index: 4, kind: input, shape index: {}]   ;;  %s3177_s5 = inlined_call_operand.vmem [shape: bf16[6,128,128], index: 5, kind: input, shape index: {}]   ;;  %s3178_s6 = inlined_call_operand.vmem [shape: f32[1,128], index: 6, kind: input, shape index: {}]   ;;  %s3179_s7 = inlined_call_operand.vmem [shape: bf16[128,128], index: 7, kind: input, shape index: {}]   ;;  %s3180_s8 = inlined_call_operand.vmem [shape: f32[1,128], index: 8, kind: input, shape index: {}]   ;;  %s3181_s9 = inlined_call_operand.hbm [shape: f32[2,128], index: 9, kind: output, shape index: {}]  }
   0x1   :  { %v2366_v0 = vld [vmem:[%s3173_s1 + $0x40] sm:$0xff]   ;;  %v2368_v2 = vld [vmem:[%s3173_s1 + $0x48] sm:$0xff]   ;;  %v2370_v4 = vld [vmem:[%s3173_s1 + $0x50] sm:$0xff]  }
   0x2   :  { %v2367_v1 = vld [vmem:[%s3173_s1] sm:$0xff]   ;;  %1985 = vmatprep.subr.bf16.mxu0 %v2366_v0  ;;  %v2369_v3 = vld [vmem:[%s3173_s1 + $0x8] sm:$0xff]   ;;  %v2371_v5 = vld [vmem:[%s3173_s1 + $0x10] sm:$0xff]  }
   0x3   :  { %1986 = vmatpush3.bf16.msra.mxu0 %v2367_v1  ;;  %v2372_v6 = vld [vmem:[%s3173_s1 + $0x58] sm:$0xff]   ;;  %v2374_v8 = vld [vmem:[%s3173_s1 + $0x60] sm:$0xff]   ;;  %v2376_v10 = vld [vmem:[%s3173_s1 + $0x68] sm:$0xff]  }
   0x4   :  { %1987 = vmatprep.subr.bf16.mxu0 %v2368_v2  ;;  %v2373_v7 = vld [vmem:[%s3173_s1 + $0x18] sm:$0xff]   ;;  %v2375_v9 = vld [vmem:[%s3173_s1 + $0x20] sm:$0xff]   ;;  %v2377_v12 = vld [vmem:[%s3173_s1 + $0x28] sm:$0xff]  }
   0x5   :  { %v2384_v11 = vld [vmem:[%s3172_s0 + $0x4] ss:$8 sps:$4 sm:$0xff]   ;;  %v2378_v13 = vld [vmem:[%s3173_s1 + $0x70] sm:$0xff]   ;;  %v2380_v15 = vld [vmem:[%s3173_s1 + $0x78] sm:$0xff]  }
   0x6   :  { %287 = vmatprep.mubr.bf16.mxu0 %v2384_v11  ;;  %v2379_v14 = vld [vmem:[%s3173_s1 + $0x30] sm:$0xff]   ;;  %v2381_v16 = vld [vmem:[%s3173_s1 + $0x38] sm:$0xff]   ;;  %v2382_v17 = vld [vmem:[%s3172_s0] ss:$8 sps:$4 sm:$0xff]  }
   0x7   :  { %1988 = vmatpush3.bf16.msra.mxu0 %v2369_v3  ;;  %v2385_v18 = vld [vmem:[%s3172_s0 + $0x14] ss:$8 sps:$4 sm:$0xff]   ;;  %v2387_v19 = vld [vmem:[%s3172_s0 + $0x10] ss:$8 sps:$4 sm:$0xff]   ;;  %v2388_v20 = vld [vmem:[%s3172_s0 + $0x24] ss:$8 sps:$4 sm:$0xff]  }
   0x8   :  { %1989 = vmatprep.subr.bf16.mxu0 %v2370_v4  ;;  %v2390_v21 = vld [vmem:[%s3172_s0 + $0x20] ss:$8 sps:$4 sm:$0xff]   ;;  %v2391_v22 = vld [vmem:[%s3172_s0 + $0x34] ss:$8 sps:$4 sm:$0xff]   ;;  %v2393_v23 = vld [vmem:[%s3172_s0 + $0x30] ss:$8 sps:$4 sm:$0xff]  }
   0x9   :  { %v2394_v24 = vld [vmem:[%s3172_s0 + $0x44] ss:$8 sps:$4 sm:$0xff]   ;;  %v2396_v25 = vld [vmem:[%s3172_s0 + $0x40] ss:$8 sps:$4 sm:$0xff]   ;;  %v2397_v26 = vld [vmem:[%s3172_s0 + $0x54] ss:$8 sps:$4 sm:$0xff]  }
   0xa   :  { %v2399_v27 = vld [vmem:[%s3172_s0 + $0x50] ss:$8 sps:$4 sm:$0xff]   ;;  %v2400_v28 = vld [vmem:[%s3172_s0 + $0x64] ss:$8 sps:$4 sm:$0x3f]  }
   0xb   :  { %1990 = vmatpush3.bf16.msra.mxu0 %v2371_v5  ;;  %v2402_v29 = vld [vmem:[%s3172_s0 + $0x60] ss:$8 sps:$4 sm:$0x3f]  }
   0xc   :  { %1991 = vmatprep.subr.bf16.mxu0 %v2372_v6 }
   0xf   :  { %1992 = vmatpush3.bf16.msra.mxu0 %v2373_v7 }
  0x10   :  { %1993 = vmatprep.subr.bf16.mxu0 %v2374_v8 }
  0x13   :  { %1994 = vmatpush3.bf16.msra.mxu0 %v2375_v9 }
  0x14   :  { %1995 = vmatprep.subr.bf16.mxu0 %v2376_v10 }
  0x17   :  { %1996 = vmatpush3.bf16.msra.mxu0 %v2377_v12 }
  0x18   :  { %1997 = vmatprep.subr.bf16.mxu0 %v2378_v13 }
  0x1b   :  { %1998 = vmatpush3.bf16.msra.mxu0 %v2379_v14 }
  0x1c   :  { %1999 = vmatprep.subr.bf16.mxu0 %v2380_v15 }
  0x1f   :  { %2000 = vmatpush3.bf16.msra.mxu0 %v2381_v16 }
  0x22   :  { %288 = vmatmul.mubr.bf16.vlgmr.msra.gmra.mrb[0].mxu0 %v2382_v17 }
  0x23   :  { %295 = vmatprep.mubr.bf16.mxu0 %v2385_v18 }
  0x2a   :  { %296 = vmatmul.mubr.bf16.gmra.mrb[4].mxu0 %v2387_v19 }
  0x2b   :  { %303 = vmatprep.mubr.bf16.mxu0 %v2388_v20 }
  0x32   :  { %304 = vmatmul.mubr.bf16.gmra.mrb[8].mxu0 %v2390_v21 }
  0x33   :  { %311 = vmatprep.mubr.bf16.mxu0 %v2391_v22 }
  0x3a   :  { %312 = vmatmul.mubr.bf16.gmra.mrb[12].mxu0 %v2393_v23 }
  0x3b   :  { %319 = vmatprep.mubr.bf16.mxu0 %v2394_v24 }
  0x42   :  { %320 = vmatmul.mubr.bf16.gmra.mrb[16].mxu0 %v2396_v25 }
  0x43   :  { %327 = vmatprep.mubr.bf16.mxu0 %v2397_v26 }
  0x4a   :  { %328 = vmatmul.mubr.bf16.gmra.mrb[20].mxu0 %v2399_v27 }
  0x4b   :  { %335 = vmatprep.mubr.bf16.mxu0 %v2400_v28 }
  0x52   :  { %336 = vmatmul.mubr.bf16.gmra.mrb[24].mxu0 %v2402_v29 }
  0x53   :  { %14 = vsyncpa [#allocation3], 0  ;;  %v2403_v30 = vld [vmem:[%s3175_s3 + $0x80] sm:$0xff]   ;;  %v2515_v31 = vmov 0.0   ;;  %v2404_v32 = vld [vmem:[%s3175_s3 + $0x88] sm:$0xff]   ;;  %vm2516_vm0 = vmmov 0   ;;  %v365_v59 = vlaneseq }
  0x54   :  { %2182 = vmatprep.subr.bf16.mxu0 %v2515_v31  ;;  %2142 = vmatprep.subr.bf16.mxu1 %v2515_v31  ;;  %v2405_v33 = vld [vmem:[%s3175_s3 + $0x90] sm:$0xff]   ;;  %v2406_v34 = vld [vmem:[%s3175_s3 + $0x98] sm:$0xff]   ;;  %v2407_v35 = vld [vmem:[%s3175_s3 + $0xa0] sm:$0xff]   ;;  %vm372_vm3 = vcmask 1042432   ;;  %vm676_vm5 = vcmask 1041408   ;;  %vm380_vm7 = vcmask 1044480  }
  0x55   :  { %2183 = vmatpush3.bf16.msra.mxu0 %v2403_v30  ;;  %v2408_v36 = vld [vmem:[%s3175_s3 + $0xa8] sm:$0xff]   ;;  %v2409_v37 = vld [vmem:[%s3175_s3 + $0x40] sm:$0xff]   ;;  %v2410_v38 = vld [vmem:[%s3175_s3 + $0xb0] sm:$0xff]   ;;  %2198 = vmatprep.mubr.msk.bf16.mxu0 %vm2516_vm0, %v2515_v31  ;;  %v366_v3 = vand.u32 127, %v365_v59  ;;  %v391_v9 = vshrl.u32 %v365_v59, 7  ;;  %v2517_v26 = vmov 0  }
  0x56   :  { %2184 = vmatprep.subr.bf16.mxu0 %v2515_v31  ;;  %2143 = vmatpush3.bf16.msra.mxu1 %v2409_v37  ;;  %v2411_v39 = vld [vmem:[%s3175_s3 + $0x48] sm:$0xff]   ;;  %v2412_v40 = vld [vmem:[%s3175_s3 + $0xb8] sm:$0xff]   ;;  %v2413_v41 = vld [vmem:[%s3175_s3 + $0x50] sm:$0xff]   ;;  %vm396_vm10 = vcmask 1040384   ;;  %vm443_vm14 = vcmask 1043456  }
  0x57   :  { %2144 = vmatprep.subr.bf16.mxu1 %v2515_v31  ;;  %2158 = vmatprep.mubr.msk.bf16.mxu1 %vm2516_vm0, %v2515_v31  ;;  %v2414_v42 = vld [vmem:[%s3175_s3 + $0x58] sm:$0xff]   ;;  %v2415_v43 = vld [vmem:[%s3175_s3 + $0x60] sm:$0xff]   ;;  %v2416_v44 = vld [vmem:[%s3175_s3 + $0x68] sm:$0xff]   ;;  %vm369_vm1 = vcmp.lt.s32.totalorder %v366_v3, 96  ;;  %vm368_vm2 = vcmp.lt.s32.totalorder %v366_v3, 64  ;;  %vm367_vm4 = vcmp.lt.s32.totalorder %v366_v3, 32 }
  0x58   :  { %v2417_v45 = vld [vmem:[%s3175_s3 + $0x70] sm:$0xff]   ;;  %v2418_v46 = vld [vmem:[%s3175_s3 + $0x78] sm:$0xff]   ;;  %v2732_v48 = vld [vmem:[%s3174_s2] ss:$0 sm:$0xff]  ;;  %v392_v21 = vsub.s32 0, %v391_v9 }
  0x59   :  { %2185 = vmatpush3.bf16.msra.mxu0 %v2404_v32  ;;  %vm2740_vm6 = vmpackc.low %vm369_vm1, %vm369_vm1 }
  0x5a   :  { %2186 = vmatprep.subr.bf16.mxu0 %v2515_v31  ;;  %2145 = vmatpush3.bf16.msra.mxu1 %v2411_v39  ;;  %vm403_vm8 = vmpackc.low %vm368_vm2, %vm368_vm2  ;;  %v389_v27 = vsel %vm2740_vm6, 65537, %v2517_v26 }
  0x5b   :  { %2146 = vmatprep.subr.bf16.mxu1 %v2515_v31  ;;  %vm416_vm9 = vmpackc.low %vm367_vm4, %vm367_vm4  ;;  %v404_v30 = vsel %vm403_vm8, 65537, %v2517_v26 }
  0x5d   :  { %2187 = vmatpush3.bf16.msra.mxu0 %v2405_v33 }
  0x5e   :  { %2188 = vmatprep.subr.bf16.mxu0 %v2515_v31  ;;  %2147 = vmatpush3.bf16.msra.mxu1 %v2413_v41 }
  0x5f   :  { %2148 = vmatprep.subr.bf16.mxu1 %v2515_v31 }
  0x61   :  { %2189 = vmatpush3.bf16.msra.mxu0 %v2406_v34 }
  0x62   :  { %2190 = vmatprep.subr.bf16.mxu0 %v2515_v31  ;;  %2149 = vmatpush3.bf16.msra.mxu1 %v2414_v42 }
  0x63   :  { %2150 = vmatprep.subr.bf16.mxu1 %v2515_v31 }
  0x65   :  { %2191 = vmatpush3.bf16.msra.mxu0 %v2407_v35 }
  0x66   :  { %2192 = vmatprep.subr.bf16.mxu0 %v2515_v31  ;;  %2151 = vmatpush3.bf16.msra.mxu1 %v2415_v43 }
  0x67   :  { %2152 = vmatprep.subr.bf16.mxu1 %v2515_v31 }
  0x69   :  { %2193 = vmatpush3.bf16.msra.mxu0 %v2408_v36 }
  0x6a   :  { %2194 = vmatprep.subr.bf16.mxu0 %v2515_v31  ;;  %2153 = vmatpush3.bf16.msra.mxu1 %v2416_v44  ;;  %v408_v44 = vrot.slane %v404_v30, %v392_v21 }
  0x6b   :  { %2154 = vmatprep.subr.bf16.mxu1 %v2515_v31 }
  0x6c   :  { %vm2766_vm12 = vcmp.ne.s16.totalorder %v408_v44, 0 }
  0x6d   :  { %2195 = vmatpush3.bf16.msra.mxu0 %v2410_v38  ;;  %v417_v38 = vsel %vm416_vm9, 65537, %v2517_v26 }
  0x6e   :  { %2196 = vmatprep.subr.bf16.mxu0 %v2515_v31  ;;  %2155 = vmatpush3.bf16.msra.mxu1 %v2417_v45 }
  0x6f   :  { %2156 = vmatprep.subr.bf16.mxu1 %v2515_v31 }
  0x71   :  { %2197 = vmatpush3.bf16.msra.mxu0 %v2412_v40  ;;  %v393_v40 = vrot.slane %v389_v27, %v392_v21 }
  0x72   :  { %2222 = vmatprep.subr.bf16.mxu0 %v2515_v31  ;;  %2157 = vmatpush3.bf16.msra.mxu1 %v2418_v46  ;;  %v421_v46 = vrot.slane %v417_v38, %v392_v21 }
  0x73   :  { %2162 = vmatprep.subr.bf16.mxu1 %v2515_v31  ;;  %vm2760_vm11 = vcmp.ne.s16.totalorder %v393_v40, 0 }
  0x74   :  { %vm2770_vm13 = vcmp.ne.s16.totalorder %v421_v46, 0 }
  0xf5   :  { %v2001_v47 = vpop.f32.mrb[0].mxu0 }
  0xf6   :  { %v2002_v49 = vpop.f32.mrb[1].mxu0 }
  0xf7   :  { %v2003_v50 = vadd.f32 %v2002_v49, %v2001_v47  ;;  %v2004_v51 = vpop.f32.mrb[2].mxu0 }
  0xf8   :  { %v2005_v52 = vpop.f32.mrb[3].mxu0 }
  0xf9   :  { %v290_v53 = vadd.f32 %v2003_v50, %v2732_v48  ;;  %v2006_v54 = vadd.f32 %v2005_v52, %v2004_v51  ;;  %v2420_v50 = vld [vmem:[%s3175_s3 + $0x8] sm:$0xff]  }
  0xfb   :  { %v293_v55 = vadd.f32 %v2006_v54, %v2732_v48  ;;  %v344_v56 = vmax.f32 %v290_v53, 0.0 }
  0xfd   :  { %v345_v57 = vmax.f32 %v293_v55, 0.0  ;;  %v2007_v58 = vpop.f32.mrb[4].mxu0  ;;  %v2421_v55 = vld [vmem:[%s3175_s3 + $0x10] sm:$0xff]  }
  0xfe   :  { %v2008_v60 = vpop.f32.mrb[5].mxu0 }
  0xff   :  { %v2736_v61 = vpack.c.bf16 %v345_v57, %v344_v56  ;;  %v2009_v62 = vadd.f32 %v2008_v60, %v2007_v58  ;;  %v2010_v63 = vpop.f32.mrb[6].mxu0  ;;  %v2430_v56 = vld [vmem:[%s3175_s3 + $0xd8] sm:$0xff]  }
 0x100   :  { %v2011_v0 = vpop.f32.mrb[7].mxu0 }
 0x101   :  { %v298_v1 = vadd.f32 %v2009_v62, %v2732_v48  ;;  %v2012_v2 = vadd.f32 %v2011_v0, %v2010_v63  ;;  %v677_v15 = vrot.slane %v2736_v61, 6  ;;  %v381_v16 = vrot.slane %v2736_v61, 3 }
 0x102   :  { %v692_v23 = vrot.slane %v2736_v61, 5  ;;  %v378_v24 = vrot.slane %v2736_v61, 1  ;;  %v411_v53 = vrot.slane %v2736_v61, 2 }
 0x103   :  { %v301_v4 = vadd.f32 %v2012_v2, %v2732_v48  ;;  %v346_v5 = vmax.f32 %v298_v1, 0.0 }
 0x104   :  { %v2785_v3 = vsel %vm372_vm3, %v2736_v61, %v411_v53 }
 0x105   :  { %v347_v6 = vmax.f32 %v301_v4, 0.0  ;;  %v2013_v7 = vpop.f32.mrb[8].mxu0 }
 0x106   :  { %v2014_v8 = vpop.f32.mrb[9].mxu0 }
 0x107   :  { %v359_v10 = vpack.c.bf16 %v347_v6, %v346_v5  ;;  %v2015_v11 = vadd.f32 %v2014_v8, %v2013_v7  ;;  %v2016_v12 = vpop.f32.mrb[10].mxu0 }
 0x108   :  { %v2017_v13 = vpop.f32.mrb[11].mxu0 }
 0x109   :  { %v382_v17 = vrot.slane %v359_v10, 3  ;;  %v678_v18 = vrot.slane %v359_v10, 6  ;;  %v306_v19 = vadd.f32 %v2015_v11, %v2732_v48  ;;  %v2018_v20 = vadd.f32 %v2017_v13, %v2016_v12 }
 0x10a   :  { %v397_v22 = vrot.slane %v359_v10, 7 }
 0x10b   :  { %v309_v25 = vadd.f32 %v2018_v20, %v2732_v48  ;;  %v679_v28 = vsel %vm676_vm5, %v677_v15, %v678_v18  ;;  %v383_v29 = vsel %vm380_vm7, %v381_v16, %v382_v17  ;;  %v348_v35 = vmax.f32 %v306_v19, 0.0 }
 0x10c   :  { %v682_v32 = vsel %vm372_vm3, %v679_v28, %v359_v10  ;;  %v695_v33 = vsel %vm372_vm3, %v692_v23, %v397_v22  ;;  %v386_v34 = vsel %vm372_vm3, %v378_v24, %v383_v29 }
 0x10d   :  { %v349_v36 = vmax.f32 %v309_v25, 0.0  ;;  %v2019_v37 = vpop.f32.mrb[12].mxu0 }
 0x10e   :  { %v2020_v39 = vpop.f32.mrb[13].mxu0 }
 0x10f   :  { %v360_v41 = vpack.c.bf16 %v349_v36, %v348_v35  ;;  %v2021_v42 = vadd.f32 %v2020_v39, %v2019_v37  ;;  %v2022_v43 = vpop.f32.mrb[14].mxu0 }
 0x110   :  { %v2023_v45 = vpop.f32.mrb[15].mxu0 }
 0x111   :  { %v314_v47 = vadd.f32 %v2021_v42, %v2732_v48  ;;  %v2024_v49 = vadd.f32 %v2023_v45, %v2022_v43  ;;  %v371_v51 = vrot.slane %v360_v41, 1  ;;  %v398_v52 = vrot.slane %v360_v41, 7 }
 0x112   :  { %v670_v9 = vrot.slane %v360_v41, 4  ;;  %v685_v14 = vrot.slane %v360_v41, 3 }
 0x113   :  { %v317_v54 = vadd.f32 %v2024_v49, %v2732_v48  ;;  %v375_v57 = vsel %vm372_vm3, %v360_v41, %v371_v51  ;;  %v399_v58 = vsel %vm396_vm10, %v397_v22, %v398_v52  ;;  %v350_v59 = vmax.f32 %v314_v47, 0.0 }
 0x114   :  { %v395_v63 = vsel %vm2760_vm11, %v386_v34, %v375_v57  ;;  %v401_v0 = vsel %vm372_vm3, %v399_v58, %v360_v41 }
 0x115   :  { %v351_v60 = vmax.f32 %v317_v54, 0.0  ;;  %v2025_v62 = vpop.f32.mrb[16].mxu0  ;;  %v2781_v2 = vsel %vm2766_vm12, %v401_v0, %v395_v63 }
 0x116   :  { %v2026_v1 = vpop.f32.mrb[17].mxu0  ;;  %v423_v7 = vsel %vm2770_vm13, %v2785_v3, %v2781_v2  ;;  %v2431_v2 = vld [vmem:[%s3175_s3 + $0xe0] sm:$0xff]   ;;  %v2432_v3 = vld [vmem:[%s3175_s3 + $0xe8] sm:$0xff]  }
 0x117   :  { %v361_v4 = vpack.c.bf16 %v351_v60, %v350_v59  ;;  %v2027_v5 = vadd.f32 %v2026_v1, %v2025_v62  ;;  %v2028_v6 = vpop.f32.mrb[18].mxu0 }
 0x118   :  { %v2029_v8 = vpop.f32.mrb[19].mxu0 }
 0x119   :  { %v452_v10 = vrot.slane %v361_v4, 4  ;;  %v671_v11 = vrot.slane %v361_v4, 5  ;;  %v322_v12 = vadd.f32 %v2027_v5, %v2732_v48  ;;  %v2030_v13 = vadd.f32 %v2029_v8, %v2028_v6 }
 0x11a   :  { %v468_v29 = vrot.slane %v361_v4, 3 }
 0x11b   :  { %v325_v61 = vadd.f32 %v2030_v13, %v2732_v48  ;;  %v674_v15 = vsel %vm372_vm3, %v670_v9, %v671_v11  ;;  %v686_v16 = vsel %vm443_vm14, %v670_v9, %v452_v10  ;;  %v352_v19 = vmax.f32 %v322_v12, 0.0 }
 0x11c   :  { %v684_v17 = vsel %vm2760_vm11, %v682_v32, %v674_v15  ;;  %v689_v18 = vsel %vm372_vm3, %v685_v14, %v686_v16 }
 0x11d   :  { %v353_v20 = vmax.f32 %v325_v61, 0.0  ;;  %v2031_v21 = vpop.f32.mrb[20].mxu0  ;;  %v691_v22 = vsel %vm2766_vm12, %v689_v18, %v684_v17  ;;  %v2419_v18 = vld [vmem:[%s3175_s3] sm:$0xff]  }
 0x11e   :  { %v2032_v23 = vpop.f32.mrb[21].mxu0  ;;  %v697_v24 = vsel %vm2770_vm13, %v695_v33, %v691_v22 }
 0x11f   :  { %v362_v25 = vpack.c.bf16 %v353_v20, %v352_v19  ;;  %v2033_v26 = vadd.f32 %v2032_v23, %v2031_v21  ;;  %v2034_v27 = vpop.f32.mrb[22].mxu0  ;;  %2199 = vmatmul.mubr.bf16.vlgmr.msra.gmra.mrb[28].mxu0 %v697_v24  ;;  %v2422_v24 = vld [vmem:[%s3175_s3 + $0x18] sm:$0xff]  }
 0x120   :  { %v2035_v28 = vpop.f32.mrb[23].mxu0  ;;  %2238 = vmatprep.mubr.msk.bf16.mxu0 %vm2516_vm0, %v2515_v31 }
 0x121   :  { %v330_v30 = vadd.f32 %v2033_v26, %v2732_v48  ;;  %v2036_v32 = vadd.f32 %v2035_v28, %v2034_v27  ;;  %v454_v34 = vrot.slane %v362_v25, 6  ;;  %v469_v35 = vrot.slane %v362_v25, 5  ;;  %v2424_v26 = vld [vmem:[%s3175_s3 + $0x28] sm:$0xff]   ;;  %v2425_v27 = vld [vmem:[%s3175_s3 + $0x30] sm:$0xff]   ;;  %v2426_v28 = vld [vmem:[%s3175_s3 + $0x38] sm:$0xff]  }
 0x122   :  { %v829_v36 = vrot.slane %v362_v25, 2  ;;  %v814_v53 = vrot.slane %v362_v25, 3  ;;  %v813_v54 = vrot.slane %v362_v25, 1 }
 0x123   :  { %v333_v37 = vadd.f32 %v2036_v32, %v2732_v48  ;;  %v457_v38 = vsel %vm372_vm3, %v452_v10, %v454_v34  ;;  %v472_v33 = vsel %vm372_vm3, %v468_v29, %v469_v35  ;;  %v354_v40 = vmax.f32 %v330_v30, 0.0  ;;  %v2427_v29 = vld [vmem:[%s3175_s3 + $0xc0] sm:$0xff]   ;;  %v2428_v30 = vld [vmem:[%s3175_s3 + $0xc8] sm:$0xff]   ;;  %v2429_v32 = vld [vmem:[%s3175_s3 + $0xd0] sm:$0xff]  }
 0x124   :  { %v2809_v39 = vsel %vm372_vm3, %v362_v25, %v829_v36  ;;  %v2423_v25 = vld [vmem:[%s3175_s3 + $0x20] sm:$0xff]   ;;  %v2434_v34 = vld [vmem:[%s3175_s3 + $0xf8] sm:$0xff]  }
 0x125   :  { %v355_v41 = vmax.f32 %v333_v37, 0.0  ;;  %v2037_v42 = vpop.f32.mrb[24].mxu0  ;;  %v2435_v35 = vld [vmem:[%s3177_s5] sm:$0xff]   ;;  %v2437_v37 = vld [vmem:[%s3177_s5 + $0x8] sm:$0xff]  }
 0x126   :  { %v2038_v43 = vpop.f32.mrb[25].mxu0  ;;  %v2436_v36 = vld [vmem:[%s3177_s5 + $0x40] sm:$0xff]  }
 0x127   :  { %v363_v44 = vpack.c.bf16 %v355_v41, %v354_v40  ;;  %v2039_v45 = vadd.f32 %v2038_v43, %v2037_v42  ;;  %v2040_v46 = vpop.f32.mrb[26].mxu0  ;;  %2223 = vmatpush3.bf16.msra.mxu0 %v2436_v36  ;;  %v2441_v40 = vld [vmem:[%s3177_s5 + $0x18] sm:$0xff]   ;;  %v2443_v42 = vld [vmem:[%s3177_s5 + $0x20] sm:$0xff]  }
 0x128   :  { %v2041_v47 = vpop.f32.mrb[27].mxu0  ;;  %2224 = vmatprep.subr.bf16.mxu0 %v2515_v31  ;;  %v2442_v41 = vld [vmem:[%s3177_s5 + $0x58] sm:$0xff]   ;;  %v2444_v43 = vld [vmem:[%s3177_s5 + $0x60] sm:$0xff]  }
 0x129   :  { %v338_v49 = vadd.f32 %v2039_v45, %v2732_v48  ;;  %v2042_v51 = vadd.f32 %v2041_v47, %v2040_v46  ;;  %v441_v52 = vrot.slane %v363_v44, 3  ;;  %v444_v0 = vrot.slane %v363_v44, 4  ;;  %v2446_v45 = vld [vmem:[%s3177_s5 + $0x68] sm:$0xff]   ;;  %v2447_v46 = vld [vmem:[%s3177_s5 + $0x30] sm:$0xff]  }
 0x12a   :  { %v806_v1 = vrot.slane %v363_v44, 7  ;;  %v821_v4 = vrot.slane %v363_v44, 6  ;;  %v460_v10 = vrot.slane %v363_v44, 2  ;;  %v2445_v44 = vld [vmem:[%s3177_s5 + $0x28] sm:$0xff]   ;;  %v2448_v47 = vld [vmem:[%s3177_s5 + $0x70] sm:$0xff]  }
 0x12b   :  { %v341_v57 = vadd.f32 %v2042_v51, %v2732_v48  ;;  %v815_v58 = vsel %vm380_vm7, %v814_v53, %v441_v52  ;;  %v356_v60 = vmax.f32 %v338_v49, 0.0  ;;  %v2449_v49 = vld [vmem:[%s3177_s5 + $0x38] sm:$0xff]  }
 0x12c   :  { %v818_v59 = vsel %vm372_vm3, %v813_v54, %v815_v58  ;;  %v2450_v51 = vld [vmem:[%s3177_s5 + $0x78] sm:$0xff]  }
 0x12d   :  { %v357_v62 = vmax.f32 %v341_v57, 0.0 }
 0x12f   :  { %v364_v63 = vpack.c.bf16 %v357_v62, %v356_v60 }
 0x131   :  { %v445_v5 = vrot.slane %v364_v63, 4  ;;  %v461_v6 = vrot.slane %v364_v63, 3  ;;  %v807_v8 = vrot.slane %v364_v63, 7  ;;  %v822_v9 = vrot.slane %v364_v63, 6 }
 0x133   :  { %v446_v11 = vsel %vm443_vm14, %v444_v0, %v445_v5  ;;  %v462_v12 = vsel %vm380_vm7, %v441_v52, %v461_v6  ;;  %v808_v48 = vsel %vm396_vm10, %v806_v1, %v807_v8  ;;  %v823_v13 = vsel %vm676_vm5, %v821_v4, %v822_v9 }
 0x134   :  { %v449_v14 = vsel %vm372_vm3, %v441_v52, %v446_v11  ;;  %v465_v61 = vsel %vm372_vm3, %v460_v10, %v462_v12  ;;  %v811_v15 = vsel %vm372_vm3, %v808_v48, %v364_v63  ;;  %v826_v16 = vsel %vm372_vm3, %v823_v13, %v807_v8  ;;  %v1846_v11 = vld [vmem:[%s3176_s4] ss:$0 sm:$0xff]  ;;  %s2518_s4 = smov [#allocation2]  }
 0x135   :  { %v459_v17 = vsel %vm2760_vm11, %v457_v38, %v449_v14  ;;  %v820_v19 = vsel %vm2760_vm11, %v818_v59, %v811_v15  ;;  %v2438_v38 = vld [vmem:[%s3177_s5 + $0x48] sm:$0xff]   ;;  %s1727_s10 = sshll.u32 %s2518_s4, 4  ;;  %s1728_s10 = int_to_ptr.vmem [resolvable:$true] %s1727_s10 }
 0x136   :  { %v467_v20 = vsel %vm2766_vm12, %v465_v61, %v459_v17  ;;  %v828_v21 = vsel %vm2766_vm12, %v826_v16, %v820_v19  ;;  %2225 = vmatpush3.bf16.msra.mxu0 %v2438_v38  ;;  %v2451_v19 = vld [vmem:[%s3177_s5 + $0xc0] sm:$0xff]   ;;  %v2470_v38 = vld [vmem:[%s3177_s5 + $0x108] sm:$0xff]   ;;  %p2496_p1 = scmp.lt.s32.totalorder %s1728_s10, %s1728_s10 }
 0x137   :  { %v474_v22 = vsel %vm2770_vm13, %v472_v33, %v467_v20  ;;  %v834_v23 = vsel %vm2770_vm13, %v2809_v39, %v828_v21  ;;  %v2439_v33 = vld [vmem:[%s3177_s5 + $0x10] sm:$0xff]   ;;  %2226 = vmatprep.subr.bf16.mxu0 %v2515_v31  ;;  %v2452_v21 = vld [vmem:[%s3177_s5 + $0x80] sm:$0xff]  }
 0x138   :  { %2159 = vmatmul.mubr.bf16.vlgmr.msra.gmra.mrb[0].mxu1 %v474_v22  ;;  %v2440_v39 = vld [vmem:[%s3177_s5 + $0x50] sm:$0xff]  }
 0x139   :  { %2163 = vmatpush3.bf16.msra.mxu1 %v2419_v18  ;;  %2178 = vmatprep.mubr.msk.bf16.mxu1 %vm2516_vm0, %v2515_v31 }
 0x13a   :  { %2164 = vmatprep.subr.bf16.mxu1 %v2515_v31  ;;  %2227 = vmatpush3.bf16.msra.mxu0 %v2440_v39  ;;  %v2472_v39 = vld [vmem:[%s3177_s5 + $0x110] sm:$0xff]  }
 0x13b   :  { %2228 = vmatprep.subr.bf16.mxu0 %v2515_v31 }
 0x13d   :  { %2165 = vmatpush3.bf16.msra.mxu1 %v2420_v50  ;;  %v2454_v50 = vld [vmem:[%s3177_s5 + $0x88] sm:$0xff]  }
 0x13e   :  { %2166 = vmatprep.subr.bf16.mxu1 %v2515_v31  ;;  %2229 = vmatpush3.bf16.msra.mxu0 %v2442_v41  ;;  %v2474_v41 = vld [vmem:[%s3177_s5 + $0x118] sm:$0xff]  }
 0x13f   :  { %2230 = vmatprep.subr.bf16.mxu0 %v2515_v31 }
 0x141   :  { %2167 = vmatpush3.bf16.msra.mxu1 %v2421_v55  ;;  %v2455_v55 = vld [vmem:[%s3177_s5 + $0xd0] sm:$0xff]  }
 0x142   :  { %2168 = vmatprep.subr.bf16.mxu1 %v2515_v31  ;;  %2231 = vmatpush3.bf16.msra.mxu0 %v2444_v43  ;;  %v2476_v43 = vld [vmem:[%s3177_s5 + $0x120] sm:$0xff]  }
 0x143   :  { %2232 = vmatprep.subr.bf16.mxu0 %v2515_v31 }
 0x145   :  { %2169 = vmatpush3.bf16.msra.mxu1 %v2422_v24  ;;  %v2456_v24 = vld [vmem:[%s3177_s5 + $0x90] sm:$0xff]  }
 0x146   :  { %2170 = vmatprep.subr.bf16.mxu1 %v2515_v31  ;;  %2233 = vmatpush3.bf16.msra.mxu0 %v2446_v45  ;;  %v2478_v45 = vld [vmem:[%s3177_s5 + $0x128] sm:$0xff]  }
 0x147   :  { %2234 = vmatprep.subr.bf16.mxu0 %v2515_v31 }
 0x149   :  { %2171 = vmatpush3.bf16.msra.mxu1 %v2423_v25  ;;  %v2457_v25 = vld [vmem:[%s3177_s5 + $0xd8] sm:$0xff]  }
 0x14a   :  { %2172 = vmatprep.subr.bf16.mxu1 %v2515_v31  ;;  %2235 = vmatpush3.bf16.msra.mxu0 %v2448_v47  ;;  %v2480_v47 = vld [vmem:[%s3177_s5 + $0x130] sm:$0xff]  }
 0x14b   :  { %2236 = vmatprep.subr.bf16.mxu0 %v2515_v31 }
 0x14d   :  { %2173 = vmatpush3.bf16.msra.mxu1 %v2424_v26  ;;  %v2458_v26 = vld [vmem:[%s3177_s5 + $0x98] sm:$0xff]  }
 0x14e   :  { %2174 = vmatprep.subr.bf16.mxu1 %v2515_v31  ;;  %2237 = vmatpush3.bf16.msra.mxu0 %v2450_v51  ;;  %v2482_v51 = vld [vmem:[%s3177_s5 + $0x138] sm:$0xff]  }
 0x14f   :  { %2262 = vmatprep.subr.bf16.mxu0 %v2515_v31 }
 0x151   :  { %2175 = vmatpush3.bf16.msra.mxu1 %v2425_v27  ;;  %v2459_v27 = vld [vmem:[%s3177_s5 + $0xe0] sm:$0xff]  }
 0x152   :  { %2176 = vmatprep.subr.bf16.mxu1 %v2515_v31 }
 0x155   :  { %2177 = vmatpush3.bf16.msra.mxu1 %v2426_v28  ;;  %v2460_v28 = vld [vmem:[%s3177_s5 + $0xa0] sm:$0xff]  }
 0x156   :  { %2202 = vmatprep.subr.bf16.mxu1 %v2515_v31 }
 0x158   :  { %2179 = vmatmul.mubr.bf16.vlgmr.msra.gmra.mrb[4].mxu1 %v423_v7  ;;  %v2433_v7 = vld [vmem:[%s3175_s3 + $0xf0] sm:$0xff]  }
 0x159   :  { %2203 = vmatpush3.bf16.msra.mxu1 %v2427_v29  ;;  %2218 = vmatprep.mubr.msk.bf16.mxu1 %vm2516_vm0, %v2515_v31  ;;  %v2461_v29 = vld [vmem:[%s3177_s5 + $0xe8] sm:$0xff]  }
 0x15a   :  { %2204 = vmatprep.subr.bf16.mxu1 %v2515_v31 }
 0x15d   :  { %2205 = vmatpush3.bf16.msra.mxu1 %v2428_v30  ;;  %v2462_v30 = vld [vmem:[%s3177_s5 + $0xa8] sm:$0xff]  }
 0x15e   :  { %2206 = vmatprep.subr.bf16.mxu1 %v2515_v31 }
 0x161   :  { %2207 = vmatpush3.bf16.msra.mxu1 %v2429_v32  ;;  %v2463_v32 = vld [vmem:[%s3177_s5 + $0xf0] sm:$0xff]  }
 0x162   :  { %2208 = vmatprep.subr.bf16.mxu1 %v2515_v31 }
 0x165   :  { %2209 = vmatpush3.bf16.msra.mxu1 %v2430_v56  ;;  %v2464_v56 = vld [vmem:[%s3177_s5 + $0xb0] sm:$0xff]  }
 0x166   :  { %2210 = vmatprep.subr.bf16.mxu1 %v2515_v31 }
 0x169   :  { %2211 = vmatpush3.bf16.msra.mxu1 %v2431_v2  ;;  %v2465_v2 = vld [vmem:[%s3177_s5 + $0xf8] sm:$0xff]  }
 0x16a   :  { %2212 = vmatprep.subr.bf16.mxu1 %v2515_v31 }
 0x16d   :  { %2213 = vmatpush3.bf16.msra.mxu1 %v2432_v3  ;;  %v2466_v3 = vld [vmem:[%s3177_s5 + $0xb8] sm:$0xff]  }
 0x16e   :  { %2214 = vmatprep.subr.bf16.mxu1 %v2515_v31 }
 0x171   :  { %2215 = vmatpush3.bf16.msra.mxu1 %v2433_v7  ;;  %v2467_v7 = vld [vmem:[%s3177_s5 + $0x140] sm:$0xff]  }
 0x172   :  { %2216 = vmatprep.subr.bf16.mxu1 %v2515_v31 }
 0x175   :  { %2217 = vmatpush3.bf16.msra.mxu1 %v2434_v34 }
 0x176   :  { %2242 = vmatprep.subr.bf16.mxu1 %v2515_v31 }
 0x178   :  { %2219 = vmatmul.mubr.bf16.vlgmr.msra.gmra.mrb[8].mxu1 %v834_v23  ;;  %v2453_v23 = vld [vmem:[%s3177_s5 + $0xc8] sm:$0xff]  }
 0x179   :  { %2258 = vmatprep.mubr.msk.bf16.mxu1 %vm2516_vm0, %v2515_v31  ;;  %2243 = vmatpush3.bf16.msra.mxu1 %v2435_v35  ;;  %v2468_v35 = vld [vmem:[%s3177_s5 + $0x100] sm:$0xff]  }
 0x17a   :  { %2244 = vmatprep.subr.bf16.mxu1 %v2515_v31 }
 0x17d   :  { %2245 = vmatpush3.bf16.msra.mxu1 %v2437_v37  ;;  %v2469_v37 = vld [vmem:[%s3177_s5 + $0x148] sm:$0xff]  }
 0x17e   :  { %2246 = vmatprep.subr.bf16.mxu1 %v2515_v31 }
 0x181   :  { %2247 = vmatpush3.bf16.msra.mxu1 %v2439_v33  ;;  %v2471_v33 = vld [vmem:[%s3177_s5 + $0x150] sm:$0xff]  }
 0x182   :  { %2248 = vmatprep.subr.bf16.mxu1 %v2515_v31 }
 0x185   :  { %2249 = vmatpush3.bf16.msra.mxu1 %v2441_v40  ;;  %v2473_v40 = vld [vmem:[%s3177_s5 + $0x158] sm:$0xff]  }
 0x186   :  { %2250 = vmatprep.subr.bf16.mxu1 %v2515_v31 }
 0x189   :  { %2251 = vmatpush3.bf16.msra.mxu1 %v2443_v42  ;;  %v2475_v42 = vld [vmem:[%s3177_s5 + $0x160] sm:$0xff]  }
 0x18a   :  { %2252 = vmatprep.subr.bf16.mxu1 %v2515_v31 }
 0x18d   :  { %2253 = vmatpush3.bf16.msra.mxu1 %v2445_v44  ;;  %v2477_v44 = vld [vmem:[%s3177_s5 + $0x168] sm:$0xff]  }
 0x18e   :  { %2254 = vmatprep.subr.bf16.mxu1 %v2515_v31 }
 0x191   :  { %2255 = vmatpush3.bf16.msra.mxu1 %v2447_v46  ;;  %v2479_v46 = vld [vmem:[%s3177_s5 + $0x170] sm:$0xff]  }
 0x192   :  { %2256 = vmatprep.subr.bf16.mxu1 %v2515_v31 }
 0x195   :  { %2257 = vmatpush3.bf16.msra.mxu1 %v2449_v49  ;;  %v2481_v49 = vld [vmem:[%s3177_s5 + $0x178] sm:$0xff]  }
 0x196   :  { %2282 = vmatprep.subr.bf16.mxu1 %v2515_v31 }
 0x1f2   :  { %v797_v52 = vpop.f32.mrb[28].mxu0 }
 0x1f3   :  { %v2200_v53 = vpop.f32.mrb[29].mxu0 }
 0x1f4   :  { %v800_v54 = vpop.f32.mrb[30].mxu0 }
 0x1f5   :  { %v2201_v57 = vpop.f32.mrb[31].mxu0 }
 0x1f6   :  { %v2484_v57 = vld [vmem:[%s3179_s7 + $0x8] sm:$0xff]  }
 0x20b   :  { %v574_v58 = vpop.f32.mrb[0].mxu1 }
 0x20c   :  { %v2160_v59 = vpop.f32.mrb[1].mxu1 }
 0x20d   :  { %v577_v60 = vpop.f32.mrb[2].mxu1  ;;  %v2486_v59 = vld [vmem:[%s3179_s7 + $0x18] sm:$0xff]  }
 0x20e   :  { %v2161_v62 = vpop.f32.mrb[3].mxu1 }
 0x20f   :  { %v2488_v62 = vld [vmem:[%s3179_s7 + $0x28] sm:$0xff]  }
 0x22b   :  { %v663_v63 = vpop.f32.mrb[4].mxu1 }
 0x22c   :  { %v664_v0 = vadd.f32 %v663_v63, %v574_v58  ;;  %v2180_v1 = vpop.f32.mrb[5].mxu1  ;;  %v2485_v58 = vld [vmem:[%s3179_s7 + $0x10] sm:$0xff]  }
 0x22d   :  { %v666_v4 = vpop.f32.mrb[6].mxu1  ;;  %v2489_v63 = vld [vmem:[%s3179_s7 + $0x30] sm:$0xff]  }
 0x22e   :  { %v667_v5 = vadd.f32 %v666_v4, %v577_v60  ;;  %v2181_v6 = vpop.f32.mrb[7].mxu1  ;;  %v804_v8 = vadd.f32 %v797_v52, %v664_v0  ;;  %v2487_v60 = vld [vmem:[%s3179_s7 + $0x20] sm:$0xff]   ;;  %v2490_v0 = vld [vmem:[%s3179_s7 + $0x38] sm:$0xff]  }
 0x230   :  { %v805_v9 = vadd.f32 %v800_v54, %v667_v5  ;;  %v2483_v54 = vld [vmem:[%s3179_s7] sm:$0xff]  }
 0x24b   :  { %v934_v10 = vpop.f32.mrb[8].mxu1 }
 0x24c   :  { %v941_v12 = vadd.f32 %v934_v10, %v804_v8  ;;  %v2220_v48 = vpop.f32.mrb[9].mxu1 }
 0x24d   :  { %v937_v13 = vpop.f32.mrb[10].mxu1 }
 0x24e   :  { %v950_v14 = vadd.f32 %v1846_v11, %v941_v12  ;;  %v942_v61 = vadd.f32 %v937_v13, %v805_v9  ;;  %v2221_v15 = vpop.f32.mrb[11].mxu1 }
 0x250   :  { %v951_v16 = vadd.f32 %v1846_v11, %v942_v61  ;;  %v952_v17 = vmax.f32 %v950_v14, 0.0 }
 0x252   :  { %v953_v18 = vmax.f32 %v951_v16, 0.0 }
 0x254   :  { %v2981_v20 = vpack.c.bf16 %v953_v18, %v952_v17 }
 0x256   :  { %2259 = vmatmul.mubr.bf16.vlgmr.msra.gmra.mrb[12].mxu1 %v2981_v20  ;;  %v989_v22 = vrot.slane %v2981_v20, 1  ;;  %v1292_v34 = vrot.slane %v2981_v20, 3  ;;  %v1184_v36 = vrot.slane %v2981_v20, 2  ;;  %v1508_v52 = vrot.slane %v2981_v20, 5 }
 0x257   :  { %2283 = vmatpush3.bf16.msra.mxu1 %v2451_v19  ;;  %2298 = vmatprep.mubr.msk.bf16.mxu1 %vm2516_vm0, %v2515_v31  ;;  %v1400_v53 = vrot.slane %v2981_v20, 4 }
 0x258   :  { %2239 = vmatmul.mubr.bf16.vlgmr.msra.gmra.mrb[32].mxu0 %v989_v22  ;;  %2284 = vmatprep.subr.bf16.mxu1 %v2515_v31 }
 0x259   :  { %2263 = vmatpush3.bf16.msra.mxu0 %v2452_v21  ;;  %2278 = vmatprep.mubr.msk.bf16.mxu0 %vm2516_vm0, %v2515_v31 }
 0x25a   :  { %2264 = vmatprep.subr.bf16.mxu0 %v2515_v31 }
 0x25b   :  { %2285 = vmatpush3.bf16.msra.mxu1 %v2453_v23 }
 0x25c   :  { %2286 = vmatprep.subr.bf16.mxu1 %v2515_v31 }
 0x25d   :  { %2265 = vmatpush3.bf16.msra.mxu0 %v2454_v50 }
 0x25e   :  { %2266 = vmatprep.subr.bf16.mxu0 %v2515_v31 }
 0x25f   :  { %2287 = vmatpush3.bf16.msra.mxu1 %v2455_v55 }
 0x260   :  { %2288 = vmatprep.subr.bf16.mxu1 %v2515_v31 }
 0x261   :  { %2267 = vmatpush3.bf16.msra.mxu0 %v2456_v24 }
 0x262   :  { %2268 = vmatprep.subr.bf16.mxu0 %v2515_v31 }
 0x263   :  { %2289 = vmatpush3.bf16.msra.mxu1 %v2457_v25  ;;  %v1975_v25 = vld [vmem:[%s3178_s6] ss:$0 sm:$0xff]  ;;  %s2491_s6 = scalar_lea.vmem %s1728_s10, 32 }
 0x264   :  { %2290 = vmatprep.subr.bf16.mxu1 %v2515_v31  ;;  %p2492_p0 = scmp.ne.s32.totalorder %s1728_s10, %s2491_s6  ;;  %p2497_p2 = scmp.lt.s32.totalorder %s2491_s6, %s2491_s6 }
 0x265   :  { %2269 = vmatpush3.bf16.msra.mxu0 %v2458_v26 }
 0x266   :  { %2270 = vmatprep.subr.bf16.mxu0 %v2515_v31  ;;  %p2498_p3 = por %p2497_p2, %p2496_p1 }
 0x267   :  { %2291 = vmatpush3.bf16.msra.mxu1 %v2459_v27 }
 0x268   :  { %2292 = vmatprep.subr.bf16.mxu1 %v2515_v31  ;;  %p2499_p4 = pnand %p2498_p3, %p2492_p0 }
 0x269   :  { %2271 = vmatpush3.bf16.msra.mxu0 %v2460_v28 }
 0x26a   :  { %2272 = vmatprep.subr.bf16.mxu0 %v2515_v31 }
 0x26b   :  { %2293 = vmatpush3.bf16.msra.mxu1 %v2461_v29 }
 0x26c   :  { %2294 = vmatprep.subr.bf16.mxu1 %v2515_v31 }
 0x26d   :  { %2273 = vmatpush3.bf16.msra.mxu0 %v2462_v30 }
 0x26e   :  { %2274 = vmatprep.subr.bf16.mxu0 %v2515_v31 }
 0x26f   :  { %2295 = vmatpush3.bf16.msra.mxu1 %v2463_v32 }
 0x270   :  { %2296 = vmatprep.subr.bf16.mxu1 %v2515_v31 }
 0x271   :  { %2275 = vmatpush3.bf16.msra.mxu0 %v2464_v56  ;;  %v1976_v56 = vld [vmem:[%s3180_s8] ss:$0 sm:$0xff] }
 0x272   :  { %2276 = vmatprep.subr.bf16.mxu0 %v2515_v31 }
 0x273   :  { %2297 = vmatpush3.bf16.msra.mxu1 %v2465_v2 }
 0x274   :  { %2322 = vmatprep.subr.bf16.mxu1 %v2515_v31 }
 0x275   :  { %2277 = vmatpush3.bf16.msra.mxu0 %v2466_v3 }
 0x276   :  { %2299 = vmatmul.mubr.bf16.vlgmr.msra.gmra.mrb[16].mxu1 %v1292_v34  ;;  %2302 = vmatprep.subr.bf16.mxu0 %v2515_v31 }
 0x277   :  { %2323 = vmatpush3.bf16.msra.mxu1 %v2467_v7  ;;  %2338 = vmatprep.mubr.msk.bf16.mxu1 %vm2516_vm0, %v2515_v31 }
 0x278   :  { %2279 = vmatmul.mubr.bf16.vlgmr.msra.gmra.mrb[36].mxu0 %v1184_v36  ;;  %2324 = vmatprep.subr.bf16.mxu1 %v2515_v31 }
 0x279   :  { %2303 = vmatpush3.bf16.msra.mxu0 %v2468_v35  ;;  %2318 = vmatprep.mubr.msk.bf16.mxu0 %vm2516_vm0, %v2515_v31 }
 0x27a   :  { %2304 = vmatprep.subr.bf16.mxu0 %v2515_v31 }
 0x27b   :  { %2325 = vmatpush3.bf16.msra.mxu1 %v2469_v37 }
 0x27c   :  { %2326 = vmatprep.subr.bf16.mxu1 %v2515_v31 }
 0x27d   :  { %2305 = vmatpush3.bf16.msra.mxu0 %v2470_v38 }
 0x27e   :  { %2306 = vmatprep.subr.bf16.mxu0 %v2515_v31 }
 0x27f   :  { %2327 = vmatpush3.bf16.msra.mxu1 %v2471_v33 }
 0x280   :  { %2328 = vmatprep.subr.bf16.mxu1 %v2515_v31 }
 0x281   :  { %2307 = vmatpush3.bf16.msra.mxu0 %v2472_v39 }
 0x282   :  { %2308 = vmatprep.subr.bf16.mxu0 %v2515_v31 }
 0x283   :  { %2329 = vmatpush3.bf16.msra.mxu1 %v2473_v40 }
 0x284   :  { %2330 = vmatprep.subr.bf16.mxu1 %v2515_v31 }
 0x285   :  { %2309 = vmatpush3.bf16.msra.mxu0 %v2474_v41 }
 0x286   :  { %2310 = vmatprep.subr.bf16.mxu0 %v2515_v31 }
 0x287   :  { %2331 = vmatpush3.bf16.msra.mxu1 %v2475_v42 }
 0x288   :  { %2332 = vmatprep.subr.bf16.mxu1 %v2515_v31 }
 0x289   :  { %2311 = vmatpush3.bf16.msra.mxu0 %v2476_v43 }
 0x28a   :  { %2312 = vmatprep.subr.bf16.mxu0 %v2515_v31 }
 0x28b   :  { %2333 = vmatpush3.bf16.msra.mxu1 %v2477_v44 }
 0x28c   :  { %2334 = vmatprep.subr.bf16.mxu1 %v2515_v31 }
 0x28d   :  { %2313 = vmatpush3.bf16.msra.mxu0 %v2478_v45 }
 0x28e   :  { %2314 = vmatprep.subr.bf16.mxu0 %v2515_v31 }
 0x28f   :  { %2335 = vmatpush3.bf16.msra.mxu1 %v2479_v46 }
 0x290   :  { %2336 = vmatprep.subr.bf16.mxu1 %v2515_v31 }
 0x291   :  { %2315 = vmatpush3.bf16.msra.mxu0 %v2480_v47 }
 0x292   :  { %2316 = vmatprep.subr.bf16.mxu0 %v2515_v31 }
 0x293   :  { %2337 = vmatpush3.bf16.msra.mxu1 %v2481_v49 }
 0x295   :  { %2317 = vmatpush3.bf16.msra.mxu0 %v2482_v51 }
 0x296   :  { %2339 = vmatmul.mubr.bf16.vlgmr.msra.gmra.mrb[20].mxu1 %v1508_v52  ;;  %2342 = vmatprep.subr.bf16.mxu0 %v2515_v31 }
 0x298   :  { %2319 = vmatmul.mubr.bf16.vlgmr.msra.gmra.mrb[40].mxu0 %v1400_v53 }
 0x299   :  { %2358 = vmatprep.mubr.msk.bf16.mxu0 %vm2516_vm0, %v2515_v31  ;;  %2343 = vmatpush3.bf16.msra.mxu0 %v2483_v54 }
 0x29a   :  { %2344 = vmatprep.subr.bf16.mxu0 %v2515_v31 }
 0x29d   :  { %2345 = vmatpush3.bf16.msra.mxu0 %v2484_v57 }
 0x29e   :  { %2346 = vmatprep.subr.bf16.mxu0 %v2515_v31 }
 0x2a1   :  { %2347 = vmatpush3.bf16.msra.mxu0 %v2485_v58 }
 0x2a2   :  { %2348 = vmatprep.subr.bf16.mxu0 %v2515_v31 }
 0x2a5   :  { %2349 = vmatpush3.bf16.msra.mxu0 %v2486_v59 }
 0x2a6   :  { %2350 = vmatprep.subr.bf16.mxu0 %v2515_v31 }
 0x2a9   :  { %2351 = vmatpush3.bf16.msra.mxu0 %v2487_v60 }
 0x2aa   :  { %2352 = vmatprep.subr.bf16.mxu0 %v2515_v31 }
 0x2ad   :  { %2353 = vmatpush3.bf16.msra.mxu0 %v2488_v62 }
 0x2ae   :  { %2354 = vmatprep.subr.bf16.mxu0 %v2515_v31 }
 0x2b1   :  { %2355 = vmatpush3.bf16.msra.mxu0 %v2489_v63 }
 0x2b2   :  { %2356 = vmatprep.subr.bf16.mxu0 %v2515_v31 }
 0x2b5   :  { %2357 = vmatpush3.bf16.msra.mxu0 %v2490_v0 }
 0x329   :  { %v1161_v1 = vpop.f32.mrb[12].mxu1 }
 0x32a   :  { %v2260_v4 = vpop.f32.mrb[13].mxu1 }
 0x32b   :  { %v1073_v5 = vpop.f32.mrb[32].mxu0  ;;  %v1164_v6 = vpop.f32.mrb[14].mxu1 }
 0x32c   :  { %v1162_v8 = vadd.f32 %v1161_v1, %v1073_v5  ;;  %v2240_v9 = vpop.f32.mrb[33].mxu0  ;;  %v2261_v10 = vpop.f32.mrb[15].mxu1 }
 0x32d   :  { %v1076_v11 = vpop.f32.mrb[34].mxu0 }
 0x32e   :  { %v2241_v12 = vpop.f32.mrb[35].mxu0 }
 0x349   :  { %v1376_v48 = vpop.f32.mrb[16].mxu1 }
 0x34a   :  { %v2300_v13 = vpop.f32.mrb[17].mxu1 }
 0x34b   :  { %v1268_v14 = vpop.f32.mrb[36].mxu0  ;;  %v1379_v61 = vpop.f32.mrb[18].mxu1 }
 0x34c   :  { %v1274_v15 = vadd.f32 %v1268_v14, %v1162_v8  ;;  %v2280_v31 = vpop.f32.mrb[37].mxu0  ;;  %v2301_v16 = vpop.f32.mrb[19].mxu1 }
 0x34d   :  { %v1271_v17 = vpop.f32.mrb[38].mxu0 }
 0x34e   :  { %v2281_v18 = vpop.f32.mrb[39].mxu0  ;;  %v1382_v19 = vadd.f32 %v1376_v48, %v1274_v15 }
 0x369   :  { %v1592_v20 = vpop.f32.mrb[20].mxu1 }
 0x36a   :  { %v2340_v21 = vpop.f32.mrb[21].mxu1 }
 0x36b   :  { %v1484_v22 = vpop.f32.mrb[40].mxu0  ;;  %v1595_v23 = vpop.f32.mrb[22].mxu1 }
 0x36c   :  { %v1490_v50 = vadd.f32 %v1484_v22, %v1382_v19  ;;  %v2320_v55 = vpop.f32.mrb[41].mxu0  ;;  %v2341_v24 = vpop.f32.mrb[23].mxu1 }
 0x36d   :  { %v1487_v26 = vpop.f32.mrb[42].mxu0 }
 0x36e   :  { %v1598_v27 = vadd.f32 %v1592_v20, %v1490_v50  ;;  %v2321_v28 = vpop.f32.mrb[43].mxu0 }
 0x370   :  { %v1606_v29 = vadd.f32 %v1975_v25, %v1598_v27 }
 0x372   :  { %v1607_v30 = vmax.f32 %v1606_v29, 0.0 }
 0x374   :  { %v1608_v32 = vpack.c.bf16 %v1607_v30, %v1607_v30 }
 0x376   :  { %2359 = vmatmul.mubr.bf16.vlgmr.msra.gmra.mrb[44].mxu0 %v1608_v32 }
 0x449   :  { %v1714_v2 = vpop.f32.mrb[44].mxu0 }
 0x44a   :  { %v1715_v3 = vadd.f32 %v1976_v56, %v1714_v2  ;;  %v2360_v7 = vpop.f32.mrb[45].mxu0 }
 0x44b   :  { %v1717_v34 = vpop.f32.mrb[46].mxu0 }
 0x44c   :  { %1720 = vst [vmem:[#allocation2] sm:$0x3] %v1715_v3  ;;  %v2361_v35 = vpop.f32.mrb[47].mxu0 }
 0x44d   :  { %2502 = shalt.err (!%p2499_p4)
}
 0x44e   :  { %s2503_s8 = scalar_lea.hbm %s3181_s9, 32 }
 0x44f   :  { %p2504_p5 = scmp.ne.s32.totalorder %s3181_s9, %s2503_s8  ;;  %p2507_p6 = scmp.lt.u32.totalorder %s2503_s8, %s3181_s9 }
 0x451   :  { %p2509_p7 = pnand %p2507_p6, %p2504_p5 }
 0x453   :  { %2512 = shalt.err (!%p2509_p7)
}
 0x454   :  { %1730 = dma.vmem_to_hbm [thread:$0]  %s1728_s10, 32, %s3181_s9, [#allocation3]  }
 0x455   :  { %2513 = dma.done.wait [#allocation3], 32  }
 0x456   :  { %2514 = vsyncadd [#allocation3], 4294967264 }
 0x457   :  { %1734 = vsyncpa [#allocation3], 1 }

</bundles_post_ra>
